<compile_context>
chip_gen: v5e
topology: v5e:2x2
jax: 0.10.0
libtpu: 0.0.40
codegen_flags: <defaults>
</compile_context>

<pallas_src>
import functools

import jax
import jax.numpy as jnp
from jax import lax
from jax.experimental import pallas as pl
from jax.experimental.pallas import tpu as pltpu


def _solver_fused_kernel(x_ref, vec_ref, wmid_ref, wfin_ref, o_ref, *,
                         eps, activation, L, din, dim_reduced):
    """One batch tile through the whole network, fully VMEM-resident.

    vec_ref packs (row layout):
      rows [0 .. din-1]              : rows of the first-layer weight W0 (din, K)
      rows [din + 3*li + {0,1,2}]    : bias / LN-gamma / LN-beta of layer li
    wmid_ref : (L-1, K, K)   weights of layers 1 .. L-1
    wfin_ref : (K, dim_reduced) final projection weight
    """
    inv_sqrt2 = 0.7071067811865476  # 1/sqrt(2)

    def vrow(r, width=None):
        # (1, width) static view of one packed parameter row.
        return vec_ref[r:r + 1, :] if width is None else vec_ref[r:r + 1, :width]

    def ln_act(y, g, be):
        # Two-pass (centered) LayerNorm — robust to large post-linear means.
        mean = jnp.mean(y, axis=-1, keepdims=True)
        ctr = y - mean
        var = jnp.mean(ctr * ctr, axis=-1, keepdims=True)
        yn = ctr * lax.rsqrt(var + eps) * g + be
        if activation == "relu":
            return jnp.maximum(yn, 0.0)
        # exact GELU (PyTorch nn.GELU default): 0.5*x*(1+erf(x/sqrt(2)))
        return 0.5 * yn * (1.0 + lax.erf(yn * inv_sqrt2))

    x = x_ref[...]                                        # (TILE_B, din)

    # Layer 0 (din=3 -> K): VPU broadcast multiply-adds; no padded MXU pass,
    # no zero-padded input DMA.
    y = vrow(din + 0)                                     # bias b0, (1, K)
    for d in range(din):
        y = y + x[:, d:d + 1] * vec_ref[d:d + 1, :]
    h = ln_act(y, vrow(din + 1), vrow(din + 2))

    # Layers 1 .. L-1 (K -> K): MXU matmuls with f32 accumulate.
    for li in range(1, L):
        r = din + 3 * li
        y = jnp.dot(h, wmid_ref[li - 1],
                    preferred_element_type=jnp.float32) + vrow(r)
        h = ln_act(y, vrow(r + 1), vrow(r + 2))

    # Final layer (K -> dim_reduced).
    r = din + 3 * L
    y = jnp.dot(h, wfin_ref[...],
                preferred_element_type=jnp.float32) + vrow(r, dim_reduced)
    o_ref[...] = ln_act(y, vrow(r + 1, dim_reduced),
                        vrow(r + 2, dim_reduced)).astype(o_ref.dtype)


def solver_forward_pallas(par, params, *, eps=1e-5, activation="gelu",
                          tile_b=256):
    """par: (batch, 3) -> (batch, dim_reduced). Single batch-tiled pallas_call."""
    B, din = par.shape
    n_total = len(params)                  # L hidden-K layers + 1 final layer
    L = n_total - 1
    K = params[0][0].shape[1]
    dim_reduced = params[-1][0].shape[1]

    # ---- pack first-layer weight + all bias/gamma/beta into one (rows, K) slab ----
    rows = [params[0][0]]                                  # W0: (din, K)
    for (w, b, g, be) in params:
        dout = w.shape[1]
        pad = K - dout
        for v in (b, g, be):
            v = v.reshape(1, dout).astype(jnp.float32)
            rows.append(jnp.pad(v, ((0, 0), (0, pad))) if pad else v)
    vec = jnp.concatenate(rows, axis=0)                    # (din + 3*(L+1), K)
    vec_rows = vec.shape[0]

    # ---- stack the K x K mid-layer weights (layers 1..L-1) into one array ----
    if L >= 2:
        w_mid = jnp.stack([params[i][0] for i in range(1, L)], axis=0)  # (L-1,K,K)
    else:
        w_mid = jnp.zeros((1, K, K), jnp.float32)          # unused placeholder
    n_mid = w_mid.shape[0]
    w_fin = params[L][0]                                   # (K, dim_reduced)

    # ---- batch tiling: multiple-of-8 tile, batch padded up to a tile multiple ----
    tile = min(tile_b, B)
    tile = ((tile + 7) // 8) * 8
    b_pad = ((B + tile - 1) // tile) * tile
    x = par if b_pad == B else jnp.pad(par, ((0, b_pad - B), (0, 0)))
    grid = (b_pad // tile,)

    kernel = functools.partial(
        _solver_fused_kernel, eps=eps, activation=activation,
        L=L, din=din, dim_reduced=dim_reduced)

    out = pl.pallas_call(
        kernel,
        out_shape=jax.ShapeDtypeStruct((b_pad, dim_reduced), jnp.float32),
        grid=grid,
        in_specs=[
            pl.BlockSpec((tile, din), lambda i: (i, 0)),          # x: batch-tiled
            pl.BlockSpec((vec_rows, K), lambda i: (0, 0)),        # packed vectors+W0
            pl.BlockSpec((n_mid, K, K), lambda i: (0, 0, 0)),     # mid weights
            pl.BlockSpec((K, dim_reduced), lambda i: (0, 0)),     # final weight
        ],
        out_specs=pl.BlockSpec((tile, dim_reduced), lambda i: (i, 0)),
        compiler_params=pltpu.CompilerParams(
            dimension_semantics=("parallel",)),                   # v7x: 2 TCs
    )(x, vec, w_mid, w_fin)

    return out[:B]


def init_solver_params(key, L=4, K=256, dim_reduced=128):
    """Deterministic synthetic parameters matching the PyTorch module's shapes."""
    params = []
    dims_in = [3] + [K] * (L - 1) + [K]
    dims_out = [K] * L + [dim_reduced]
    for din, dout in zip(dims_in, dims_out):
        key, kw, kb = jax.random.split(key, 3)
        w = jax.random.normal(kw, (din, dout), jnp.float32) * (1.0 / jnp.sqrt(din))
        b = jax.random.normal(kb, (dout,), jnp.float32) * 0.01
        gamma = jnp.ones((dout,), jnp.float32)     # LayerNorm weight init
        beta = jnp.zeros((dout,), jnp.float32)     # LayerNorm bias init
        params.append((w, b, gamma, beta))
    return params


@jax.jit
def solver_forward(par, params):
    return solver_forward_pallas(par, params, activation="gelu")


def _reference_forward(par, params, eps=1e-5):
    """Pure-JAX reference for a sanity check."""
    x = par
    for (w, b, g, be) in params:
        y = x @ w + b
        mean = jnp.mean(y, axis=-1, keepdims=True)
        var = jnp.mean((y - mean) ** 2, axis=-1, keepdims=True)
        yn = (y - mean) / jnp.sqrt(var + eps) * g + be
        x = 0.5 * yn * (1.0 + lax.erf(yn / jnp.sqrt(2.0)))
    return x


if __name__ == "__main__":
    key = jax.random.PRNGKey(0)
    k_par, k_w = jax.random.split(key)

    params = init_solver_params(k_w, L=4, K=256, dim_reduced=128)

    # Small batch (single grid step, padded to one 8-row tile).
    batch = 8
    par = jax.random.normal(k_par, (batch, 3), jnp.float32)
    out = jax.block_until_ready(solver_forward(par, params))
    ref = _reference_forward(par, params)
    assert out.shape == (batch, 128), out.shape
    assert jnp.allclose(out, ref, atol=1e-4, rtol=1e-4), "mismatch vs reference (small batch)"

    # Larger batch exercising the batch-tiled grid + tail padding path.
    par2 = jax.random.normal(jax.random.PRNGKey(1), (300, 3), jnp.float32)
    out2 = jax.block_until_ready(solver_forward(par2, params))
    ref2 = _reference_forward(par2, params)
    assert out2.shape == (300, 128), out2.shape
    assert jnp.allclose(out2, ref2, atol=1e-4, rtol=1e-4), "mismatch vs reference (tiled batch)"

    print("KERNEL_OK")
</pallas_src>

<mosaic_0001>
module attributes {stable_mosaic.version = 11 : i64} {
  func.func @_solver_fused_kernel(%arg0: i32, %arg1: memref<8x3xf32, #tpu.memory_space<vmem>>, %arg2: memref<18x256xf32, #tpu.memory_space<vmem>>, %arg3: memref<3x256x256xf32, #tpu.memory_space<vmem>>, %arg4: memref<256x128xf32, #tpu.memory_space<vmem>>, %arg5: memref<8x128xf32, #tpu.memory_space<vmem>>) attributes {dimension_semantics = [#tpu.dimension_semantics<parallel>], iteration_bounds = array<i64: 1>, scalar_prefetch = 0 : i64, scratch_operands = 0 : i64, tpu.core_type = #tpu.core_type<tc>, window_params = [{transform_indices = @transform_0, window_bounds = array<i64: 8, 3>}, {pipeline_mode = #tpu.pipeline_mode<synchronous>, transform_indices = @transform_1, window_bounds = array<i64: 18, 256>}, {pipeline_mode = #tpu.pipeline_mode<synchronous>, transform_indices = @transform_2, window_bounds = array<i64: 3, 256, 256>}, {pipeline_mode = #tpu.pipeline_mode<synchronous>, transform_indices = @transform_3, window_bounds = array<i64: 256, 128>}, {transform_indices = @transform_4, window_bounds = array<i64: 8, 128>}]} {
    %c0 = arith.constant 0 : index
    %c0_0 = arith.constant 0 : index
    %0 = vector.load %arg1[%c0, %c0_0] : memref<8x3xf32, #tpu.memory_space<vmem>>, vector<8x3xf32>
    %c3 = arith.constant 3 : index
    %c0_1 = arith.constant 0 : index
    %1 = vector.load %arg2[%c3, %c0_1] : memref<18x256xf32, #tpu.memory_space<vmem>>, vector<1x256xf32>
    %2 = vector.extract_strided_slice %0 {offsets = [0, 0], sizes = [8, 1], strides = [1, 1]} : vector<8x3xf32> to vector<8x1xf32>
    %c0_2 = arith.constant 0 : index
    %c0_3 = arith.constant 0 : index
    %3 = vector.load %arg2[%c0_2, %c0_3] : memref<18x256xf32, #tpu.memory_space<vmem>>, vector<1x256xf32>
    %4 = vector.broadcast %2 : vector<8x1xf32> to vector<8x256xf32>
    %5 = vector.broadcast %3 : vector<1x256xf32> to vector<8x256xf32>
    %6 = arith.mulf %4, %5 : vector<8x256xf32>
    %7 = vector.broadcast %1 : vector<1x256xf32> to vector<8x256xf32>
    %8 = arith.addf %7, %6 : vector<8x256xf32>
    %9 = vector.extract_strided_slice %0 {offsets = [0, 1], sizes = [8, 1], strides = [1, 1]} : vector<8x3xf32> to vector<8x1xf32>
    %c1 = arith.constant 1 : index
    %c0_4 = arith.constant 0 : index
    %10 = vector.load %arg2[%c1, %c0_4] : memref<18x256xf32, #tpu.memory_space<vmem>>, vector<1x256xf32>
    %11 = vector.broadcast %9 : vector<8x1xf32> to vector<8x256xf32>
    %12 = vector.broadcast %10 : vector<1x256xf32> to vector<8x256xf32>
    %13 = arith.mulf %11, %12 : vector<8x256xf32>
    %14 = arith.addf %8, %13 : vector<8x256xf32>
    %15 = vector.extract_strided_slice %0 {offsets = [0, 2], sizes = [8, 1], strides = [1, 1]} : vector<8x3xf32> to vector<8x1xf32>
    %c2 = arith.constant 2 : index
    %c0_5 = arith.constant 0 : index
    %16 = vector.load %arg2[%c2, %c0_5] : memref<18x256xf32, #tpu.memory_space<vmem>>, vector<1x256xf32>
    %17 = vector.broadcast %15 : vector<8x1xf32> to vector<8x256xf32>
    %18 = vector.broadcast %16 : vector<1x256xf32> to vector<8x256xf32>
    %19 = arith.mulf %17, %18 : vector<8x256xf32>
    %20 = arith.addf %14, %19 : vector<8x256xf32>
    %c4 = arith.constant 4 : index
    %c0_6 = arith.constant 0 : index
    %21 = vector.load %arg2[%c4, %c0_6] : memref<18x256xf32, #tpu.memory_space<vmem>>, vector<1x256xf32>
    %c5 = arith.constant 5 : index
    %c0_7 = arith.constant 0 : index
    %22 = vector.load %arg2[%c5, %c0_7] : memref<18x256xf32, #tpu.memory_space<vmem>>, vector<1x256xf32>
    %cst = arith.constant dense<0.000000e+00> : vector<8xf32>
    %23 = vector.multi_reduction <add>, %20, %cst [1] : vector<8x256xf32> to vector<8xf32>
    %24 = vector.shape_cast %23 : vector<8xf32> to vector<8x1xf32>
    %cst_8 = arith.constant 2.560000e+02 : f32
    %25 = vector.broadcast %cst_8 : f32 to vector<8x1xf32>
    %26 = arith.divf %24, %25 : vector<8x1xf32>
    %27 = vector.broadcast %26 : vector<8x1xf32> to vector<8x256xf32>
    %28 = arith.subf %20, %27 : vector<8x256xf32>
    %29 = arith.mulf %28, %28 : vector<8x256xf32>
    %cst_9 = arith.constant dense<0.000000e+00> : vector<8xf32>
    %30 = vector.multi_reduction <add>, %29, %cst_9 [1] : vector<8x256xf32> to vector<8xf32>
    %31 = vector.shape_cast %30 : vector<8xf32> to vector<8x1xf32>
    %cst_10 = arith.constant 2.560000e+02 : f32
    %32 = vector.broadcast %cst_10 : f32 to vector<8x1xf32>
    %33 = arith.divf %31, %32 : vector<8x1xf32>
    %cst_11 = arith.constant 9.99999974E-6 : f32
    %34 = vector.broadcast %cst_11 : f32 to vector<8x1xf32>
    %35 = arith.addf %33, %34 : vector<8x1xf32>
    %36 = math.rsqrt %35 : vector<8x1xf32>
    %37 = vector.broadcast %36 : vector<8x1xf32> to vector<8x256xf32>
    %38 = arith.mulf %28, %37 : vector<8x256xf32>
    %39 = vector.broadcast %21 : vector<1x256xf32> to vector<8x256xf32>
    %40 = arith.mulf %38, %39 : vector<8x256xf32>
    %41 = vector.broadcast %22 : vector<1x256xf32> to vector<8x256xf32>
    %42 = arith.addf %40, %41 : vector<8x256xf32>
    %cst_12 = arith.constant 5.000000e-01 : f32
    %43 = vector.broadcast %cst_12 : f32 to vector<8x256xf32>
    %44 = arith.mulf %43, %42 : vector<8x256xf32>
    %cst_13 = arith.constant 0.707106769 : f32
    %45 = vector.broadcast %cst_13 : f32 to vector<8x256xf32>
    %46 = arith.mulf %42, %45 : vector<8x256xf32>
    %47 = math.erf %46 : vector<8x256xf32>
    %cst_14 = arith.constant 1.000000e+00 : f32
    %48 = vector.broadcast %cst_14 : f32 to vector<8x256xf32>
    %49 = arith.addf %48, %47 : vector<8x256xf32>
    %50 = arith.mulf %44, %49 : vector<8x256xf32>
    %c0_15 = arith.constant 0 : index
    %c0_16 = arith.constant 0 : index
    %c0_17 = arith.constant 0 : index
    %51 = vector.load %arg3[%c0_15, %c0_16, %c0_17] : memref<3x256x256xf32, #tpu.memory_space<vmem>>, vector<1x256x256xf32>
    %52 = vector.shape_cast %51 : vector<1x256x256xf32> to vector<256x256xf32>
    %cst_18 = arith.constant dense<0.000000e+00> : vector<8x256xf32>
    %53 = tpu.matmul %50, %52, %cst_18 {dimension_numbers = #tpu.dot_dimension_numbers<[1], [0], [0], [1], [0, 0, 1, 1], [], []>} : vector<8x256xf32>, vector<256x256xf32>, vector<8x256xf32> -> vector<8x256xf32>
    %c6 = arith.constant 6 : index
    %c0_19 = arith.constant 0 : index
    %54 = vector.load %arg2[%c6, %c0_19] : memref<18x256xf32, #tpu.memory_space<vmem>>, vector<1x256xf32>
    %55 = vector.broadcast %54 : vector<1x256xf32> to vector<8x256xf32>
    %56 = arith.addf %53, %55 : vector<8x256xf32>
    %c7 = arith.constant 7 : index
    %c0_20 = arith.constant 0 : index
    %57 = vector.load %arg2[%c7, %c0_20] : memref<18x256xf32, #tpu.memory_space<vmem>>, vector<1x256xf32>
    %c8 = arith.constant 8 : index
    %c0_21 = arith.constant 0 : index
    %58 = vector.load %arg2[%c8, %c0_21] : memref<18x256xf32, #tpu.memory_space<vmem>>, vector<1x256xf32>
    %cst_22 = arith.constant dense<0.000000e+00> : vector<8xf32>
    %59 = vector.multi_reduction <add>, %56, %cst_22 [1] : vector<8x256xf32> to vector<8xf32>
    %60 = vector.shape_cast %59 : vector<8xf32> to vector<8x1xf32>
    %cst_23 = arith.constant 2.560000e+02 : f32
    %61 = vector.broadcast %cst_23 : f32 to vector<8x1xf32>
    %62 = arith.divf %60, %61 : vector<8x1xf32>
    %63 = vector.broadcast %62 : vector<8x1xf32> to vector<8x256xf32>
    %64 = arith.subf %56, %63 : vector<8x256xf32>
    %65 = arith.mulf %64, %64 : vector<8x256xf32>
    %cst_24 = arith.constant dense<0.000000e+00> : vector<8xf32>
    %66 = vector.multi_reduction <add>, %65, %cst_24 [1] : vector<8x256xf32> to vector<8xf32>
    %67 = vector.shape_cast %66 : vector<8xf32> to vector<8x1xf32>
    %cst_25 = arith.constant 2.560000e+02 : f32
    %68 = vector.broadcast %cst_25 : f32 to vector<8x1xf32>
    %69 = arith.divf %67, %68 : vector<8x1xf32>
    %cst_26 = arith.constant 9.99999974E-6 : f32
    %70 = vector.broadcast %cst_26 : f32 to vector<8x1xf32>
    %71 = arith.addf %69, %70 : vector<8x1xf32>
    %72 = math.rsqrt %71 : vector<8x1xf32>
    %73 = vector.broadcast %72 : vector<8x1xf32> to vector<8x256xf32>
    %74 = arith.mulf %64, %73 : vector<8x256xf32>
    %75 = vector.broadcast %57 : vector<1x256xf32> to vector<8x256xf32>
    %76 = arith.mulf %74, %75 : vector<8x256xf32>
    %77 = vector.broadcast %58 : vector<1x256xf32> to vector<8x256xf32>
    %78 = arith.addf %76, %77 : vector<8x256xf32>
    %cst_27 = arith.constant 5.000000e-01 : f32
    %79 = vector.broadcast %cst_27 : f32 to vector<8x256xf32>
    %80 = arith.mulf %79, %78 : vector<8x256xf32>
    %cst_28 = arith.constant 0.707106769 : f32
    %81 = vector.broadcast %cst_28 : f32 to vector<8x256xf32>
    %82 = arith.mulf %78, %81 : vector<8x256xf32>
    %83 = math.erf %82 : vector<8x256xf32>
    %cst_29 = arith.constant 1.000000e+00 : f32
    %84 = vector.broadcast %cst_29 : f32 to vector<8x256xf32>
    %85 = arith.addf %84, %83 : vector<8x256xf32>
    %86 = arith.mulf %80, %85 : vector<8x256xf32>
    %c1_30 = arith.constant 1 : index
    %c0_31 = arith.constant 0 : index
    %c0_32 = arith.constant 0 : index
    %87 = vector.load %arg3[%c1_30, %c0_31, %c0_32] : memref<3x256x256xf32, #tpu.memory_space<vmem>>, vector<1x256x256xf32>
    %88 = vector.shape_cast %87 : vector<1x256x256xf32> to vector<256x256xf32>
    %cst_33 = arith.constant dense<0.000000e+00> : vector<8x256xf32>
    %89 = tpu.matmul %86, %88, %cst_33 {dimension_numbers = #tpu.dot_dimension_numbers<[1], [0], [0], [1], [0, 0, 1, 1], [], []>} : vector<8x256xf32>, vector<256x256xf32>, vector<8x256xf32> -> vector<8x256xf32>
    %c9 = arith.constant 9 : index
    %c0_34 = arith.constant 0 : index
    %90 = vector.load %arg2[%c9, %c0_34] : memref<18x256xf32, #tpu.memory_space<vmem>>, vector<1x256xf32>
    %91 = vector.broadcast %90 : vector<1x256xf32> to vector<8x256xf32>
    %92 = arith.addf %89, %91 : vector<8x256xf32>
    %c10 = arith.constant 10 : index
    %c0_35 = arith.constant 0 : index
    %93 = vector.load %arg2[%c10, %c0_35] : memref<18x256xf32, #tpu.memory_space<vmem>>, vector<1x256xf32>
    %c11 = arith.constant 11 : index
    %c0_36 = arith.constant 0 : index
    %94 = vector.load %arg2[%c11, %c0_36] : memref<18x256xf32, #tpu.memory_space<vmem>>, vector<1x256xf32>
    %cst_37 = arith.constant dense<0.000000e+00> : vector<8xf32>
    %95 = vector.multi_reduction <add>, %92, %cst_37 [1] : vector<8x256xf32> to vector<8xf32>
    %96 = vector.shape_cast %95 : vector<8xf32> to vector<8x1xf32>
    %cst_38 = arith.constant 2.560000e+02 : f32
    %97 = vector.broadcast %cst_38 : f32 to vector<8x1xf32>
    %98 = arith.divf %96, %97 : vector<8x1xf32>
    %99 = vector.broadcast %98 : vector<8x1xf32> to vector<8x256xf32>
    %100 = arith.subf %92, %99 : vector<8x256xf32>
    %101 = arith.mulf %100, %100 : vector<8x256xf32>
    %cst_39 = arith.constant dense<0.000000e+00> : vector<8xf32>
    %102 = vector.multi_reduction <add>, %101, %cst_39 [1] : vector<8x256xf32> to vector<8xf32>
    %103 = vector.shape_cast %102 : vector<8xf32> to vector<8x1xf32>
    %cst_40 = arith.constant 2.560000e+02 : f32
    %104 = vector.broadcast %cst_40 : f32 to vector<8x1xf32>
    %105 = arith.divf %103, %104 : vector<8x1xf32>
    %cst_41 = arith.constant 9.99999974E-6 : f32
    %106 = vector.broadcast %cst_41 : f32 to vector<8x1xf32>
    %107 = arith.addf %105, %106 : vector<8x1xf32>
    %108 = math.rsqrt %107 : vector<8x1xf32>
    %109 = vector.broadcast %108 : vector<8x1xf32> to vector<8x256xf32>
    %110 = arith.mulf %100, %109 : vector<8x256xf32>
    %111 = vector.broadcast %93 : vector<1x256xf32> to vector<8x256xf32>
    %112 = arith.mulf %110, %111 : vector<8x256xf32>
    %113 = vector.broadcast %94 : vector<1x256xf32> to vector<8x256xf32>
    %114 = arith.addf %112, %113 : vector<8x256xf32>
    %cst_42 = arith.constant 5.000000e-01 : f32
    %115 = vector.broadcast %cst_42 : f32 to vector<8x256xf32>
    %116 = arith.mulf %115, %114 : vector<8x256xf32>
    %cst_43 = arith.constant 0.707106769 : f32
    %117 = vector.broadcast %cst_43 : f32 to vector<8x256xf32>
    %118 = arith.mulf %114, %117 : vector<8x256xf32>
    %119 = math.erf %118 : vector<8x256xf32>
    %cst_44 = arith.constant 1.000000e+00 : f32
    %120 = vector.broadcast %cst_44 : f32 to vector<8x256xf32>
    %121 = arith.addf %120, %119 : vector<8x256xf32>
    %122 = arith.mulf %116, %121 : vector<8x256xf32>
    %c2_45 = arith.constant 2 : index
    %c0_46 = arith.constant 0 : index
    %c0_47 = arith.constant 0 : index
    %123 = vector.load %arg3[%c2_45, %c0_46, %c0_47] : memref<3x256x256xf32, #tpu.memory_space<vmem>>, vector<1x256x256xf32>
    %124 = vector.shape_cast %123 : vector<1x256x256xf32> to vector<256x256xf32>
    %cst_48 = arith.constant dense<0.000000e+00> : vector<8x256xf32>
    %125 = tpu.matmul %122, %124, %cst_48 {dimension_numbers = #tpu.dot_dimension_numbers<[1], [0], [0], [1], [0, 0, 1, 1], [], []>} : vector<8x256xf32>, vector<256x256xf32>, vector<8x256xf32> -> vector<8x256xf32>
    %c12 = arith.constant 12 : index
    %c0_49 = arith.constant 0 : index
    %126 = vector.load %arg2[%c12, %c0_49] : memref<18x256xf32, #tpu.memory_space<vmem>>, vector<1x256xf32>
    %127 = vector.broadcast %126 : vector<1x256xf32> to vector<8x256xf32>
    %128 = arith.addf %125, %127 : vector<8x256xf32>
    %c13 = arith.constant 13 : index
    %c0_50 = arith.constant 0 : index
    %129 = vector.load %arg2[%c13, %c0_50] : memref<18x256xf32, #tpu.memory_space<vmem>>, vector<1x256xf32>
    %c14 = arith.constant 14 : index
    %c0_51 = arith.constant 0 : index
    %130 = vector.load %arg2[%c14, %c0_51] : memref<18x256xf32, #tpu.memory_space<vmem>>, vector<1x256xf32>
    %cst_52 = arith.constant dense<0.000000e+00> : vector<8xf32>
    %131 = vector.multi_reduction <add>, %128, %cst_52 [1] : vector<8x256xf32> to vector<8xf32>
    %132 = vector.shape_cast %131 : vector<8xf32> to vector<8x1xf32>
    %cst_53 = arith.constant 2.560000e+02 : f32
    %133 = vector.broadcast %cst_53 : f32 to vector<8x1xf32>
    %134 = arith.divf %132, %133 : vector<8x1xf32>
    %135 = vector.broadcast %134 : vector<8x1xf32> to vector<8x256xf32>
    %136 = arith.subf %128, %135 : vector<8x256xf32>
    %137 = arith.mulf %136, %136 : vector<8x256xf32>
    %cst_54 = arith.constant dense<0.000000e+00> : vector<8xf32>
    %138 = vector.multi_reduction <add>, %137, %cst_54 [1] : vector<8x256xf32> to vector<8xf32>
    %139 = vector.shape_cast %138 : vector<8xf32> to vector<8x1xf32>
    %cst_55 = arith.constant 2.560000e+02 : f32
    %140 = vector.broadcast %cst_55 : f32 to vector<8x1xf32>
    %141 = arith.divf %139, %140 : vector<8x1xf32>
    %cst_56 = arith.constant 9.99999974E-6 : f32
    %142 = vector.broadcast %cst_56 : f32 to vector<8x1xf32>
    %143 = arith.addf %141, %142 : vector<8x1xf32>
    %144 = math.rsqrt %143 : vector<8x1xf32>
    %145 = vector.broadcast %144 : vector<8x1xf32> to vector<8x256xf32>
    %146 = arith.mulf %136, %145 : vector<8x256xf32>
    %147 = vector.broadcast %129 : vector<1x256xf32> to vector<8x256xf32>
    %148 = arith.mulf %146, %147 : vector<8x256xf32>
    %149 = vector.broadcast %130 : vector<1x256xf32> to vector<8x256xf32>
    %150 = arith.addf %148, %149 : vector<8x256xf32>
    %cst_57 = arith.constant 5.000000e-01 : f32
    %151 = vector.broadcast %cst_57 : f32 to vector<8x256xf32>
    %152 = arith.mulf %151, %150 : vector<8x256xf32>
    %cst_58 = arith.constant 0.707106769 : f32
    %153 = vector.broadcast %cst_58 : f32 to vector<8x256xf32>
    %154 = arith.mulf %150, %153 : vector<8x256xf32>
    %155 = math.erf %154 : vector<8x256xf32>
    %cst_59 = arith.constant 1.000000e+00 : f32
    %156 = vector.broadcast %cst_59 : f32 to vector<8x256xf32>
    %157 = arith.addf %156, %155 : vector<8x256xf32>
    %158 = arith.mulf %152, %157 : vector<8x256xf32>
    %c0_60 = arith.constant 0 : index
    %c0_61 = arith.constant 0 : index
    %159 = vector.load %arg4[%c0_60, %c0_61] : memref<256x128xf32, #tpu.memory_space<vmem>>, vector<256x128xf32>
    %cst_62 = arith.constant dense<0.000000e+00> : vector<8x128xf32>
    %160 = tpu.matmul %158, %159, %cst_62 {dimension_numbers = #tpu.dot_dimension_numbers<[1], [0], [0], [1], [0, 0, 1, 1], [], []>} : vector<8x256xf32>, vector<256x128xf32>, vector<8x128xf32> -> vector<8x128xf32>
    %c15 = arith.constant 15 : index
    %c0_63 = arith.constant 0 : index
    %161 = vector.load %arg2[%c15, %c0_63] : memref<18x256xf32, #tpu.memory_space<vmem>>, vector<1x128xf32>
    %162 = vector.broadcast %161 : vector<1x128xf32> to vector<8x128xf32>
    %163 = arith.addf %160, %162 : vector<8x128xf32>
    %c16 = arith.constant 16 : index
    %c0_64 = arith.constant 0 : index
    %164 = vector.load %arg2[%c16, %c0_64] : memref<18x256xf32, #tpu.memory_space<vmem>>, vector<1x128xf32>
    %c17 = arith.constant 17 : index
    %c0_65 = arith.constant 0 : index
    %165 = vector.load %arg2[%c17, %c0_65] : memref<18x256xf32, #tpu.memory_space<vmem>>, vector<1x128xf32>
    %cst_66 = arith.constant dense<0.000000e+00> : vector<8xf32>
    %166 = vector.multi_reduction <add>, %163, %cst_66 [1] : vector<8x128xf32> to vector<8xf32>
    %167 = vector.shape_cast %166 : vector<8xf32> to vector<8x1xf32>
    %cst_67 = arith.constant 1.280000e+02 : f32
    %168 = vector.broadcast %cst_67 : f32 to vector<8x1xf32>
    %169 = arith.divf %167, %168 : vector<8x1xf32>
    %170 = vector.broadcast %169 : vector<8x1xf32> to vector<8x128xf32>
    %171 = arith.subf %163, %170 : vector<8x128xf32>
    %172 = arith.mulf %171, %171 : vector<8x128xf32>
    %cst_68 = arith.constant dense<0.000000e+00> : vector<8xf32>
    %173 = vector.multi_reduction <add>, %172, %cst_68 [1] : vector<8x128xf32> to vector<8xf32>
    %174 = vector.shape_cast %173 : vector<8xf32> to vector<8x1xf32>
    %cst_69 = arith.constant 1.280000e+02 : f32
    %175 = vector.broadcast %cst_69 : f32 to vector<8x1xf32>
    %176 = arith.divf %174, %175 : vector<8x1xf32>
    %cst_70 = arith.constant 9.99999974E-6 : f32
    %177 = vector.broadcast %cst_70 : f32 to vector<8x1xf32>
    %178 = arith.addf %176, %177 : vector<8x1xf32>
    %179 = math.rsqrt %178 : vector<8x1xf32>
    %180 = vector.broadcast %179 : vector<8x1xf32> to vector<8x128xf32>
    %181 = arith.mulf %171, %180 : vector<8x128xf32>
    %182 = vector.broadcast %164 : vector<1x128xf32> to vector<8x128xf32>
    %183 = arith.mulf %181, %182 : vector<8x128xf32>
    %184 = vector.broadcast %165 : vector<1x128xf32> to vector<8x128xf32>
    %185 = arith.addf %183, %184 : vector<8x128xf32>
    %cst_71 = arith.constant 5.000000e-01 : f32
    %186 = vector.broadcast %cst_71 : f32 to vector<8x128xf32>
    %187 = arith.mulf %186, %185 : vector<8x128xf32>
    %cst_72 = arith.constant 0.707106769 : f32
    %188 = vector.broadcast %cst_72 : f32 to vector<8x128xf32>
    %189 = arith.mulf %185, %188 : vector<8x128xf32>
    %190 = math.erf %189 : vector<8x128xf32>
    %cst_73 = arith.constant 1.000000e+00 : f32
    %191 = vector.broadcast %cst_73 : f32 to vector<8x128xf32>
    %192 = arith.addf %191, %190 : vector<8x128xf32>
    %193 = arith.mulf %187, %192 : vector<8x128xf32>
    %c0_74 = arith.constant 0 : index
    %c0_75 = arith.constant 0 : index
    %194 = vector.load %arg5[%c0_74, %c0_75] : memref<8x128xf32, #tpu.memory_space<vmem>>, vector<8x128xf32>
    tpu.vector_store %arg5[%c0_74, %c0_75], %193 {strides = array<i32>} : memref<8x128xf32, #tpu.memory_space<vmem>>, vector<8x128xf32>,
    return
  }
  func.func @transform_0(%arg0: i32) -> (i32, i32) {
    %c0_i32 = arith.constant 0 : i32
    %c0_i32_0 = arith.constant 0 : i32
    return %arg0, %c0_i32 : i32, i32
  }
  func.func @transform_1(%arg0: i32) -> (i32, i32) {
    %c0_i32 = arith.constant 0 : i32
    %c0_i32_0 = arith.constant 0 : i32
    %c0_i32_1 = arith.constant 0 : i32
    return %c0_i32, %c0_i32_0 : i32, i32
  }
  func.func @transform_2(%arg0: i32) -> (i32, i32, i32) {
    %c0_i32 = arith.constant 0 : i32
    %c0_i32_0 = arith.constant 0 : i32
    %c0_i32_1 = arith.constant 0 : i32
    %c0_i32_2 = arith.constant 0 : i32
    return %c0_i32, %c0_i32_0, %c0_i32_1 : i32, i32, i32
  }
  func.func @transform_3(%arg0: i32) -> (i32, i32) {
    %c0_i32 = arith.constant 0 : i32
    %c0_i32_0 = arith.constant 0 : i32
    %c0_i32_1 = arith.constant 0 : i32
    return %c0_i32, %c0_i32_0 : i32, i32
  }
  func.func @transform_4(%arg0: i32) -> (i32, i32) {
    %c0_i32 = arith.constant 0 : i32
    %c0_i32_0 = arith.constant 0 : i32
    return %arg0, %c0_i32 : i32, i32
  }
}

</mosaic_0001>

<bundles_post_ra>
// kernel: solver_forward.1
= control target key start
LH: loop header
LB: loop body
LE: loop exit
PB: predicated region body
PF: predicated region fallthrough
CT: control target
= control target key end

     0   :  { %s2344_s0 = inlined_call_operand.vmem [shape: f32[8,3], index: 0, kind: input, shape index: {}]   ;;  %s2345_s1 = inlined_call_operand.vmem [shape: f32[18,256], index: 1, kind: input, shape index: {}]   ;;  %s2346_s2 = inlined_call_operand.vmem [shape: f32[3,256,256], index: 2, kind: input, shape index: {}]   ;;  %s2347_s3 = inlined_call_operand.vmem [shape: f32[256,128], index: 3, kind: input, shape index: {}]   ;;  %s2348_s4 = inlined_call_operand.hbm [shape: f32[8,128], index: 4, kind: output, shape index: {}]  }
   0x1   :  { %v18_v0 = vld [vmem:[%s2344_s0] sm:$0xff] }
   0x2   :  { %9 = vsyncpa [#allocation3], 0  ;;  %v1441_v1 = vmov 0   ;;  %v1442_v2 = vmov 2   ;;  %v1443_v3 = vmov 1   ;;  %v1444_v32 = vmov 256.0  }
   0x3   :  { %1379 = vset.pattern.permute.xlu0 %v1441_v1  ;;  %1381 = vset.pattern.permute.xlu1 %v1442_v2  ;;  %v21_v4 = vld [vmem:[%s2345_s1] ss:$8 sm:$0x3]  ;;  %v1222_v6 = vld [vmem:[%s2345_s1 + $0x3] ss:$8 sm:$0x3]  ;;  %1383 = vrcp.f32 %v1444_v32 }
   0x4   :  { %24 = vperm.xlu0 %1379, %v18_v0   ;;  %59 = vperm.xlu1 %1381, %v18_v0   ;;  %v28_v7 = vperm.slane %v21_v4, 0  ;;  %v29_v8 = vperm.slane %v21_v4, 1  ;;  %v1224_v9 = vld [vmem:[%s2345_s1 + $0x2] ss:$8 sm:$0x3]  ;;  %v35_v11 = vperm.slane %v1222_v6, 0 }
   0x5   :  { %v1223_v10 = vld [vmem:[%s2345_s1 + $0x1] ss:$8 sm:$0x3]  ;;  %v36_v12 = vperm.slane %v1222_v6, 1  ;;  %v63_v13 = vperm.slane %v1224_v9, 0  ;;  %v64_v14 = vperm.slane %v1224_v9, 1 }
   0x6   :  { %v48_v17 = vperm.slane %v1223_v10, 0  ;;  %v49_v18 = vperm.slane %v1223_v10, 1  ;;  %v239_v46 = vld [vmem:[%s2346_s2 + $0xf0] sm:$0xff]  ;;  %v240_v48 = vld [vmem:[%s2346_s2 + $0xf8] sm:$0xff]  ;;  %v237_v50 = vld [vmem:[%s2346_s2 + $0xe0] sm:$0xff]  ;;  %s1213_s14 = sshll.u32 %s2348_s4, 4  ;;  %s1214_s14 = int_to_ptr.hbm [resolvable:$true] %s1213_s14 }
   0x7   :  { %v271_v47 = vld [vmem:[%s2346_s2 + $0x1f0] sm:$0xff]  ;;  %280 = vmatpush.msra.mxu0 %v239_v46  ;;  %v272_v49 = vld [vmem:[%s2346_s2 + $0x1f8] sm:$0xff]  ;;  %v269_v51 = vld [vmem:[%s2346_s2 + $0x1e0] sm:$0xff]  ;;  %320 = vmatpush.msra.mxu2 %v240_v48 }
   0x8   :  { %300 = vmatpush.msra.mxu1 %v271_v47  ;;  %340 = vmatpush.msra.mxu3 %v272_v49  ;;  %v238_v52 = vld [vmem:[%s2346_s2 + $0xe8] sm:$0xff]  ;;  %v235_v54 = vld [vmem:[%s2346_s2 + $0xd0] sm:$0xff]  ;;  %v236_v56 = vld [vmem:[%s2346_s2 + $0xd8] sm:$0xff] }
   0x9   :  { %v1384_v33 = vpop.eup %1383  ;;  %v270_v53 = vld [vmem:[%s2346_s2 + $0x1e8] sm:$0xff]  ;;  %281 = vmatpush.msra.mxu0 %v237_v50  ;;  %v267_v55 = vld [vmem:[%s2346_s2 + $0x1d0] sm:$0xff]  ;;  %v268_v57 = vld [vmem:[%s2346_s2 + $0x1d8] sm:$0xff]  ;;  %321 = vmatpush.msra.mxu2 %v238_v52 }
   0xa   :  { %v79_v34 = vmul.f32 256.0, %v1384_v33  ;;  %vm83_vm0 = vweird.f32 %v1384_v33  ;;  %301 = vmatpush.msra.mxu1 %v269_v51  ;;  %341 = vmatpush.msra.mxu3 %v270_v53  ;;  %v233_v58 = vld [vmem:[%s2346_s2 + $0xc0] sm:$0xff]  ;;  %v234_v60 = vld [vmem:[%s2346_s2 + $0xc8] sm:$0xff]  ;;  %v231_v62 = vld [vmem:[%s2346_s2 + $0xb0] sm:$0xff] }
   0xb   :  { %v265_v59 = vld [vmem:[%s2346_s2 + $0x1c0] sm:$0xff]  ;;  %282 = vmatpush.msra.mxu0 %v235_v54  ;;  %v266_v61 = vld [vmem:[%s2346_s2 + $0x1c8] sm:$0xff]  ;;  %322 = vmatpush.msra.mxu2 %v236_v56  ;;  %v263_v63 = vld [vmem:[%s2346_s2 + $0x1b0] sm:$0xff] }
   0xc   :  { %1380 = vset.pattern.permute.xlu0 %v1443_v3  ;;  %v80_v35 = vsub.f32 1.0, %v79_v34  ;;  %302 = vmatpush.msra.mxu1 %v267_v55  ;;  %v264_v1 = vld [vmem:[%s2346_s2 + $0x1b8] sm:$0xff]  ;;  %v261_v3 = vld [vmem:[%s2346_s2 + $0x1a0] sm:$0xff]  ;;  %v230_v4 = vld [vmem:[%s2346_s2 + $0xa8] sm:$0xff] }
   0xd   :  { %44 = vperm.xlu0 %1380, %v18_v0   ;;  %342 = vmatpush.msra.mxu3 %v268_v57  ;;  %v232_v0 = vld [vmem:[%s2346_s2 + $0xb8] sm:$0xff]  ;;  %v218_v32 = vld [vmem:[%s2346_s2 + $0x48] sm:$0xff]  ;;  %v211_v48 = vld [vmem:[%s2346_s2 + $0x10] sm:$0xff] }
   0xe   :  { %v81_v36 = vmul.f32 %v1384_v33, %v80_v35  ;;  %283 = vmatpush.msra.mxu0 %v233_v58  ;;  %303 = vmatpush.msra.mxu1 %v265_v59  ;;  %v228_v10 = vld [vmem:[%s2346_s2 + $0x98] sm:$0xff]  ;;  %v215_v35 = vld [vmem:[%s2346_s2 + $0x30] sm:$0xff]  ;;  %v246_v46 = vld [vmem:[%s2346_s2 + $0x128] sm:$0xff] }
   0xf   :  { %323 = vmatpush.msra.mxu2 %v234_v60  ;;  %343 = vmatpush.msra.mxu3 %v266_v61  ;;  %v243_v49 = vld [vmem:[%s2346_s2 + $0x110] sm:$0xff]  ;;  %v212_v50 = vld [vmem:[%s2346_s2 + $0x18] sm:$0xff]  ;;  %v209_v53 = vld [vmem:[%s2346_s2] sm:$0xff] }
  0x10   :  { %v82_v37 = vadd.f32 %v1384_v33, %v81_v36  ;;  %284 = vmatpush.msra.mxu0 %v231_v62  ;;  %304 = vmatpush.msra.mxu1 %v263_v63  ;;  %v247_v36 = vld [vmem:[%s2346_s2 + $0x130] sm:$0xff]  ;;  %v244_v51 = vld [vmem:[%s2346_s2 + $0x118] sm:$0xff]  ;;  %v241_v54 = vld [vmem:[%s2346_s2 + $0x100] sm:$0xff] }
  0x11   :  { %324 = vmatpush.msra.mxu2 %v232_v0  ;;  %344 = vmatpush.msra.mxu3 %v264_v1  ;;  %v1225_v55 = vld [vmem:[%s2345_s1 + $0x4] ss:$8 sm:$0x3]  ;;  %v1226_v59 = vld [vmem:[%s2345_s1 + $0x5] ss:$8 sm:$0x3] }
  0x12   :  { %v1487_v38 = vsel %vm83_vm0, %v1384_v33, %v82_v37  ;;  %305 = vmatpush.msra.mxu1 %v261_v3  ;;  %v250_v33 = vld [vmem:[%s2346_s2 + $0x148] sm:$0xff]  ;;  %v216_v37 = vld [vmem:[%s2346_s2 + $0x38] sm:$0xff]  ;;  %v108_v60 = vperm.slane %v1225_v55, 0  ;;  %v109_v61 = vperm.slane %v1225_v55, 1  ;;  %v115_v0 = vperm.slane %v1226_v59, 0 }
  0x13   :  { %325 = vmatpush.msra.mxu2 %v230_v4  ;;  %v210_v56 = vld [vmem:[%s2346_s2 + $0x8] sm:$0xff] }
  0x14   :  { %v242_v57 = vld [vmem:[%s2346_s2 + $0x108] sm:$0xff] }
  0x15   :  { %1382 = vset.pattern.permute.xlu0 %v1442_v2  ;;  %v229_v2 = vld [vmem:[%s2346_s2 + $0xa0] sm:$0xff]  ;;  %326 = vmatpush.msra.mxu2 %v228_v10 }
  0x16   :  { %285 = vmatpush.msra.mxu0 %v229_v2  ;;  %v116_v2 = vperm.slane %v1226_v59, 1 }
  0x76   :  { %v25_v5 = vpop.permute.xlu0 %24  ;;  %v60_v19 = vpop.permute.xlu1 %59 }
  0x77   :  { %v32_v15 = vmul.f32 %v28_v7, %v25_v5  ;;  %v33_v16 = vmul.f32 %v29_v8, %v25_v5  ;;  %v67_v21 = vmul.f32 %v63_v13, %v60_v19  ;;  %v68_v22 = vmul.f32 %v64_v14, %v60_v19  ;;  %v262_v5 = vld [vmem:[%s2346_s2 + $0x1a8] sm:$0xff]  ;;  %v227_v7 = vld [vmem:[%s2346_s2 + $0x90] sm:$0xff]  ;;  %v257_v13 = vld [vmem:[%s2346_s2 + $0x180] sm:$0xff] }
  0x78   :  { %v259_v8 = vld [vmem:[%s2346_s2 + $0x190] sm:$0xff]  ;;  %345 = vmatpush.msra.mxu3 %v262_v5  ;;  %286 = vmatpush.msra.mxu0 %v227_v7  ;;  %v224_v19 = vld [vmem:[%s2346_s2 + $0x78] sm:$0xff] }
  0x79   :  { %v39_v23 = vadd.f32 %v35_v11, %v32_v15  ;;  %v40_v24 = vadd.f32 %v36_v12, %v33_v16  ;;  %v260_v11 = vld [vmem:[%s2346_s2 + $0x198] sm:$0xff]  ;;  %v225_v12 = vld [vmem:[%s2346_s2 + $0x80] sm:$0xff]  ;;  %306 = vmatpush.msra.mxu1 %v259_v8  ;;  %v226_v15 = vld [vmem:[%s2346_s2 + $0x88] sm:$0xff] }
  0x7a   :  { %v258_v16 = vld [vmem:[%s2346_s2 + $0x188] sm:$0xff]  ;;  %346 = vmatpush.msra.mxu3 %v260_v11  ;;  %287 = vmatpush.msra.mxu0 %v225_v12 }
  0x7b   :  { %307 = vmatpush.msra.mxu1 %v257_v13  ;;  %327 = vmatpush.msra.mxu2 %v226_v15 }
  0x7c   :  { %347 = vmatpush.msra.mxu3 %v258_v16 }
  0x7d   :  { %328 = vmatpush.msra.mxu2 %v224_v19 }
  0x7f   :  { %v45_v20 = vpop.permute.xlu0 %44 }
  0x80   :  { %v52_v25 = vmul.f32 %v48_v17, %v45_v20  ;;  %v53_v26 = vmul.f32 %v49_v18, %v45_v20  ;;  %v223_v17 = vld [vmem:[%s2346_s2 + $0x70] sm:$0xff]  ;;  %v256_v20 = vld [vmem:[%s2346_s2 + $0x178] sm:$0xff] }
  0x81   :  { %v255_v18 = vld [vmem:[%s2346_s2 + $0x170] sm:$0xff]  ;;  %288 = vmatpush.msra.mxu0 %v223_v17  ;;  %348 = vmatpush.msra.mxu3 %v256_v20 }
  0x82   :  { %v54_v27 = vadd.f32 %v52_v25, %v39_v23  ;;  %v55_v28 = vadd.f32 %v53_v26, %v40_v24  ;;  %308 = vmatpush.msra.mxu1 %v255_v18  ;;  %v222_v23 = vld [vmem:[%s2346_s2 + $0x68] sm:$0xff]  ;;  %v219_v25 = vld [vmem:[%s2346_s2 + $0x50] sm:$0xff] }
  0x83   :  { %v254_v24 = vld [vmem:[%s2346_s2 + $0x168] sm:$0xff]  ;;  %v251_v26 = vld [vmem:[%s2346_s2 + $0x150] sm:$0xff]  ;;  %329 = vmatpush.msra.mxu2 %v222_v23 }
  0x84   :  { %v69_v29 = vadd.f32 %v67_v21, %v54_v27  ;;  %v70_v30 = vadd.f32 %v68_v22, %v55_v28  ;;  %v221_v21 = vld [vmem:[%s2346_s2 + $0x60] sm:$0xff]  ;;  %v220_v27 = vld [vmem:[%s2346_s2 + $0x58] sm:$0xff]  ;;  %349 = vmatpush.msra.mxu3 %v254_v24 }
  0x85   :  { %v253_v22 = vld [vmem:[%s2346_s2 + $0x160] sm:$0xff]  ;;  %289 = vmatpush.msra.mxu0 %v221_v21  ;;  %v252_v28 = vld [vmem:[%s2346_s2 + $0x158] sm:$0xff]  ;;  %330 = vmatpush.msra.mxu2 %v220_v27 }
  0x86   :  { %v75_v31 = vadd.f32 %v70_v30, %v69_v29  ;;  %309 = vmatpush.msra.mxu1 %v253_v22  ;;  %350 = vmatpush.msra.mxu3 %v252_v28 }
  0x87   :  { %290 = vmatpush.msra.mxu0 %v219_v25  ;;  %331 = vmatpush.msra.mxu2 %v218_v32 }
  0x88   :  { %76 = vadd.xlane.f32.xlu1 %v75_v31  ;;  %310 = vmatpush.msra.mxu1 %v251_v26 }
  0x89   :  { %351 = vmatpush.msra.mxu3 %v250_v33  ;;  %332 = vmatpush.msra.mxu2 %v216_v37 }
  0xfb   :  { %v77_v39 = vpop.xlane.xlu1 %76 }
  0xfc   :  { %v85_v40 = vmul.f32 %v1487_v38, %v77_v39  ;;  %v248_v39 = vld [vmem:[%s2346_s2 + $0x138] sm:$0xff] }
  0xfd   :  { %352 = vmatpush.msra.mxu3 %v248_v39 }
  0xfe   :  { %v1490_v41 = vsub.f32 %v69_v29, %v85_v40  ;;  %v1492_v42 = vsub.f32 %v70_v30, %v85_v40  ;;  %v217_v29 = vld [vmem:[%s2346_s2 + $0x40] sm:$0xff] }
  0xff   :  { %v249_v30 = vld [vmem:[%s2346_s2 + $0x140] sm:$0xff]  ;;  %291 = vmatpush.msra.mxu0 %v217_v29  ;;  %353 = vmatpush.msra.mxu3 %v246_v46 }
 0x100   :  { %v88_v43 = vmul.f32 %v1490_v41, %v1490_v41  ;;  %v89_v44 = vmul.f32 %v1492_v42, %v1492_v42  ;;  %311 = vmatpush.msra.mxu1 %v249_v30 }
 0x101   :  { %292 = vmatpush.msra.mxu0 %v215_v35  ;;  %354 = vmatpush.msra.mxu3 %v244_v51 }
 0x102   :  { %v90_v45 = vadd.f32 %v89_v44, %v88_v43  ;;  %v213_v43 = vld [vmem:[%s2346_s2 + $0x20] sm:$0xff]  ;;  %312 = vmatpush.msra.mxu1 %v247_v36 }
 0x103   :  { %v245_v44 = vld [vmem:[%s2346_s2 + $0x120] sm:$0xff]  ;;  %293 = vmatpush.msra.mxu0 %v213_v43  ;;  %355 = vmatpush.msra.mxu3 %v242_v57 }
 0x104   :  { %91 = vadd.xlane.f32.xlu2 %v90_v45  ;;  %v214_v45 = vld [vmem:[%s2346_s2 + $0x28] sm:$0xff]  ;;  %313 = vmatpush.msra.mxu1 %v245_v44 }
 0x105   :  { %333 = vmatpush.msra.mxu2 %v214_v45  ;;  %294 = vmatpush.msra.mxu0 %v211_v48 }
 0x106   :  { %314 = vmatpush.msra.mxu1 %v243_v49 }
 0x107   :  { %334 = vmatpush.msra.mxu2 %v212_v50  ;;  %295 = vmatpush.msra.mxu0 %v209_v53 }
 0x108   :  { %315 = vmatpush.msra.mxu1 %v241_v54 }
 0x109   :  { %335 = vmatpush.msra.mxu2 %v210_v56 }
 0x177   :  { %v92_v6 = vpop.xlane.xlu2 %91 }
 0x178   :  { %v93_v9 = vmul.f32 %v92_v6, %v1487_v38 }
 0x17a   :  { %v1589_v14 = vadd.f32 1e-05, %v93_v9 }
 0x17c   :  { %1385 = vrsqrt.f32 %v1589_v14  ;;  %vm101_vm2 = vweird.f32 %v1589_v14 }
 0x182   :  { %v1386_v31 = vpop.eup %1385 }
 0x183   :  { %v96_v34 = vmul.f32 %v1386_v31, %v1589_v14  ;;  %vm102_vm1 = vweird.f32 %v1386_v31 }
 0x184   :  { %vm103_vm3 = vmor %vm101_vm2, %vm102_vm1 }
 0x185   :  { %v97_v40 = vmul.f32 %v1386_v31, %v96_v34 }
 0x187   :  { %v98_v47 = vmul.f32 0.5, %v97_v40 }
 0x189   :  { %v99_v52 = vsub.f32 1.5, %v98_v47 }
 0x18b   :  { %v100_v58 = vmul.f32 %v1386_v31, %v99_v52 }
 0x18d   :  { %v104_v62 = vsel %vm103_vm3, %v1386_v31, %v100_v58 }
 0x18e   :  { %v105_v63 = vmul.f32 %v104_v62, %v1490_v41  ;;  %v106_v1 = vmul.f32 %v104_v62, %v1492_v42 }
 0x190   :  { %v112_v3 = vmul.f32 %v108_v60, %v105_v63  ;;  %v113_v4 = vmul.f32 %v109_v61, %v106_v1 }
 0x192   :  { %v1705_v5 = vadd.f32 %v115_v0, %v112_v3  ;;  %v1707_v6 = vadd.f32 %v116_v2, %v113_v4 }
 0x194   :  { %v1710_v7 = vmul.f32 0.70710677, %v1705_v5  ;;  %v1713_v8 = vmul.f32 0.70710677, %v1707_v6 }
 0x196   :  { %v125_v9 = vmul.f32 %v1710_v7, %v1710_v7  ;;  %v165_v41 = vmul.f32 %v1713_v8, %v1713_v8 }
 0x198   :  { %v126_v42 = vmin.f32 %v125_v9, 16.0  ;;  %v166_v10 = vmin.f32 %v165_v41, 16.0 }
 0x19a   :  { %v127_v11 = vmul.f32 2.1237322e-06, %v126_v42  ;;  %v138_v12 = vmul.f32 3.8918573e-05, %v126_v42  ;;  %v167_v13 = vmul.f32 2.1237322e-06, %v166_v10 }
 0x19b   :  { %v178_v14 = vmul.f32 3.8918573e-05, %v166_v10 }
 0x19c   :  { %v128_v15 = vadd.f32 0.00028619796, %v127_v11  ;;  %v139_v16 = vadd.f32 0.001143296, %v138_v12  ;;  %v168_v17 = vadd.f32 0.00028619796, %v167_v13 }
 0x19d   :  { %v179_v18 = vadd.f32 0.001143296, %v178_v14 }
 0x19e   :  { %v129_v19 = vmul.f32 %v128_v15, %v126_v42  ;;  %v140_v20 = vmul.f32 %v139_v16, %v126_v42  ;;  %v169_v21 = vmul.f32 %v168_v17, %v166_v10 }
 0x19f   :  { %v180_v22 = vmul.f32 %v179_v18, %v166_v10  ;;  %v121_v18 = vmul.f32 0.5, %v1705_v5 }
 0x1a0   :  { %v130_v23 = vadd.f32 0.0036580483, %v129_v19  ;;  %v141_v24 = vadd.f32 0.014752088, %v140_v20  ;;  %v170_v27 = vadd.f32 0.0036580483, %v169_v21 }
 0x1a1   :  { %v181_v25 = vadd.f32 0.014752088, %v180_v22  ;;  %v122_v20 = vmul.f32 0.5, %v1707_v6 }
 0x1a2   :  { %v142_v26 = vmul.f32 %v141_v24, %v126_v42  ;;  %v131_v29 = vmul.f32 %v130_v23, %v126_v42  ;;  %v171_v33 = vmul.f32 %v170_v27, %v166_v10 }
 0x1a3   :  { %v182_v28 = vmul.f32 %v181_v25, %v166_v10 }
 0x1a4   :  { %v143_v30 = vadd.f32 0.112945676, %v142_v26  ;;  %v132_v35 = vadd.f32 0.05243302, %v131_v29  ;;  %v172_v40 = vadd.f32 0.05243302, %v171_v33 }
 0x1a5   :  { %v183_v31 = vadd.f32 0.112945676, %v182_v28 }
 0x1a6   :  { %v144_v32 = vmul.f32 %v143_v30, %v126_v42  ;;  %v133_v44 = vmul.f32 %v132_v35, %v126_v42  ;;  %v173_v47 = vmul.f32 %v172_v40, %v166_v10  ;;  %v1264_v40 = vld [vmem:[%s2346_s2 + $0x2f0] sm:$0xff] }
 0x1a7   :  { %v184_v34 = vmul.f32 %v183_v31, %v166_v10  ;;  %563 = vmatpush.msrb.mxu0 %v1264_v40  ;;  %v1239_v40 = vld [vmem:[%s2346_s2 + $0x228] sm:$0xff] }
 0x1a8   :  { %v145_v36 = vadd.f32 0.4994258, %v144_v32  ;;  %v134_v48 = vadd.f32 0.18741608, %v133_v44  ;;  %v174_v49 = vadd.f32 0.18741608, %v173_v47 }
 0x1a9   :  { %v185_v37 = vadd.f32 0.4994258, %v184_v34  ;;  %v1265_v44 = vld [vmem:[%s2346_s2 + $0x2f8] sm:$0xff]  ;;  %v1294_v47 = vld [vmem:[%s2346_s2 + $0x3e0] sm:$0xff] }
 0x1aa   :  { %v146_v39 = vmul.f32 %v145_v36, %v126_v42  ;;  %v135_v51 = vmul.f32 %v134_v48, %v126_v42  ;;  %v175_v54 = vmul.f32 %v174_v49, %v166_v10  ;;  %603 = vmatpush.msrb.mxu2 %v1265_v44  ;;  %v1263_v48 = vld [vmem:[%s2346_s2 + $0x2e8] sm:$0xff]  ;;  %v1236_v44 = vld [vmem:[%s2346_s2 + $0x210] sm:$0xff] }
 0x1ab   :  { %v186_v43 = vmul.f32 %v185_v37, %v166_v10  ;;  %v1295_v49 = vld [vmem:[%s2346_s2 + $0x3e8] sm:$0xff] }
 0x1ac   :  { %v147_v45 = vadd.f32 1.0, %v146_v39  ;;  %v136_v57 = vadd.f32 1.1283791, %v135_v51  ;;  %v176_v63 = vadd.f32 1.1283791, %v175_v54  ;;  %v1292_v51 = vld [vmem:[%s2346_s2 + $0x3d0] sm:$0xff]  ;;  %604 = vmatpush.msrb.mxu2 %v1263_v48 }
 0x1ad   :  { %v187_v46 = vadd.f32 1.0, %v186_v43  ;;  %v1296_v43 = vld [vmem:[%s2346_s2 + $0x3f0] sm:$0xff]  ;;  %v1258_v54 = vld [vmem:[%s2346_s2 + $0x2c0] sm:$0xff]  ;;  %v1269_v48 = vld [vmem:[%s2346_s2 + $0x318] sm:$0xff] }
 0x1ae   :  { %1387 = vrcp.f32 %v147_v45  ;;  %v159_v58 = vand.u32 2147483648, %v147_v45  ;;  %v157_v61 = vand.u32 2147483647, %v147_v45  ;;  %vm153_vm6 = vweird.f32 %v147_v45  ;;  %583 = vmatpush.msrb.mxu1 %v1296_v43  ;;  %v1271_v43 = vld [vmem:[%s2346_s2 + $0x328] sm:$0xff] }
 0x1af   :  { %1389 = vrcp.f32 %v187_v46  ;;  %v199_v62 = vand.u32 2147483648, %v187_v46  ;;  %v197_v1 = vand.u32 2147483647, %v187_v46  ;;  %vm193_vm8 = vweird.f32 %v187_v46 }
 0x1b0   :  { %v160_v3 = vor.u32 1.1754944e-38, %v159_v58  ;;  %v137_v9 = vmul.f32 %v136_v57, %v1710_v7  ;;  %vm158_vm9 = vcmp.eq.f32.partialorder %v157_v61, 8.507059e+37  ;;  %v177_v11 = vmul.f32 %v176_v63, %v1713_v8  ;;  %v1229_v8 = vld [vmem:[%s2345_s1 + $0x6] ss:$8 sm:$0x3]  ;;  %584 = vmatpush.msrb.mxu1 %v1294_v47  ;;  %v1256_v58 = vld [vmem:[%s2346_s2 + $0x2b0] sm:$0xff] }
 0x1b1   :  { %v200_v42 = vor.u32 1.1754944e-38, %v199_v62  ;;  %vm198_vm11 = vcmp.eq.f32.partialorder %v197_v1, 8.507059e+37  ;;  %v276_v23 = vperm.slane %v1229_v8, 0  ;;  %v277_v25 = vperm.slane %v1229_v8, 1  ;;  %v1291_v57 = vld [vmem:[%s2346_s2 + $0x3c8] sm:$0xff]  ;;  %v1289_v61 = vld [vmem:[%s2346_s2 + $0x3b8] sm:$0xff] }
 0x1b2   :  { %585 = vmatpush.msrb.mxu1 %v1292_v51  ;;  %v1254_v62 = vld [vmem:[%s2346_s2 + $0x2a0] sm:$0xff]  ;;  %v1255_v1 = vld [vmem:[%s2346_s2 + $0x2a8] sm:$0xff]  ;;  %v1276_v8 = vld [vmem:[%s2346_s2 + $0x350] sm:$0xff] }
 0x1b3   :  { %v1286_v63 = vld [vmem:[%s2346_s2 + $0x3a0] sm:$0xff]  ;;  %v1237_v47 = vld [vmem:[%s2346_s2 + $0x218] sm:$0xff] }
 0x1b4   :  { %v1388_v50 = vpop.eup %1387  ;;  %v1266_v51 = vld [vmem:[%s2346_s2 + $0x300] sm:$0xff] }
 0x1b5   :  { %v1390_v52 = vpop.eup %1389  ;;  %v149_v53 = vmul.f32 %v1388_v50, %v147_v45  ;;  %vm154_vm4 = vweird.f32 %v1388_v50  ;;  %v1297_v45 = vld [vmem:[%s2346_s2 + $0x3f8] sm:$0xff] }
 0x1b6   :  { %v189_v55 = vmul.f32 %v1390_v52, %v187_v46  ;;  %vm194_vm5 = vweird.f32 %v1390_v52  ;;  %vm155_vm7 = vmor %vm153_vm6, %vm154_vm4  ;;  %v1262_v46 = vld [vmem:[%s2346_s2 + $0x2e0] sm:$0xff]  ;;  %623 = vmatpush.msrb.mxu3 %v1297_v45  ;;  %v1268_v45 = vld [vmem:[%s2346_s2 + $0x310] sm:$0xff] }
 0x1b7   :  { %v150_v56 = vsub.f32 1.0, %v149_v53  ;;  %vm195_vm10 = vmor %vm193_vm8, %vm194_vm5  ;;  %564 = vmatpush.msrb.mxu0 %v1262_v46  ;;  %v1293_v53 = vld [vmem:[%s2346_s2 + $0x3d8] sm:$0xff] }
 0x1b8   :  { %v190_v59 = vsub.f32 1.0, %v189_v55  ;;  %624 = vmatpush.msrb.mxu3 %v1295_v49  ;;  %v1290_v55 = vld [vmem:[%s2346_s2 + $0x3c0] sm:$0xff] }
 0x1b9   :  { %v151_v60 = vmul.f32 %v1388_v50, %v150_v56  ;;  %v1259_v56 = vld [vmem:[%s2346_s2 + $0x2c8] sm:$0xff]  ;;  %586 = vmatpush.msrb.mxu1 %v1290_v55  ;;  %v1231_v55 = vld [vmem:[%s2345_s1 + $0x10] ss:$8 sm:$0x3] }
 0x1ba   :  { %v191_v0 = vmul.f32 %v1390_v52, %v190_v59  ;;  %625 = vmatpush.msrb.mxu3 %v1293_v53  ;;  %v1288_v59 = vld [vmem:[%s2346_s2 + $0x3b0] sm:$0xff]  ;;  %v1230_v49 = vld [vmem:[%s2345_s1 + $0x7] ss:$8 sm:$0x3] }
 0x1bb   :  { %v152_v2 = vadd.f32 %v1388_v50, %v151_v60  ;;  %v1257_v60 = vld [vmem:[%s2346_s2 + $0x2b8] sm:$0xff]  ;;  %587 = vmatpush.msrb.mxu1 %v1288_v59  ;;  %v1235_v53 = vld [vmem:[%s2346_s2 + $0x208] sm:$0xff] }
 0x1bc   :  { %v192_v4 = vadd.f32 %v1390_v52, %v191_v0  ;;  %626 = vmatpush.msrb.mxu3 %v1291_v57  ;;  %v391_v57 = vperm.slane %v1230_v49, 1 }
 0x1bd   :  { %v156_v41 = vsel %vm155_vm7, %v1388_v50, %v152_v2  ;;  %v1260_v50 = vld [vmem:[%s2346_s2 + $0x2d0] sm:$0xff]  ;;  %v1287_v2 = vld [vmem:[%s2346_s2 + $0x3a8] sm:$0xff]  ;;  %588 = vmatpush.msrb.mxu1 %v1286_v63 }
 0x1be   :  { %v161_v10 = vsel %vm158_vm9, %v160_v3, %v156_v41  ;;  %v196_v12 = vsel %vm195_vm10, %v1390_v52, %v192_v4  ;;  %v1261_v52 = vld [vmem:[%s2346_s2 + $0x2d8] sm:$0xff]  ;;  %565 = vmatpush.msrb.mxu0 %v1260_v50  ;;  %627 = vmatpush.msrb.mxu3 %v1289_v61  ;;  %v1252_v4 = vld [vmem:[%s2346_s2 + $0x290] sm:$0xff]  ;;  %v1234_v50 = vld [vmem:[%s2346_s2 + $0x200] sm:$0xff]  ;;  %v397_v61 = vperm.slane %v1231_v55, 0 }
 0x1bf   :  { %v162_v13 = vmul.f32 %v161_v10, %v137_v9  ;;  %v201_v14 = vsel %vm198_vm11, %v200_v42, %v196_v12  ;;  %605 = vmatpush.msrb.mxu2 %v1261_v52  ;;  %v1284_v9 = vld [vmem:[%s2346_s2 + $0x390] sm:$0xff]  ;;  %v1253_v41 = vld [vmem:[%s2346_s2 + $0x298] sm:$0xff]  ;;  %v1282_v12 = vld [vmem:[%s2346_s2 + $0x380] sm:$0xff] }
 0x1c0   :  { %v202_v15 = vmul.f32 %v201_v14, %v177_v11  ;;  %566 = vmatpush.msrb.mxu0 %v1258_v54  ;;  %v1285_v42 = vld [vmem:[%s2346_s2 + $0x398] sm:$0xff]  ;;  %628 = vmatpush.msrb.mxu3 %v1287_v2  ;;  %v1250_v11 = vld [vmem:[%s2346_s2 + $0x280] sm:$0xff]  ;;  %v1283_v14 = vld [vmem:[%s2346_s2 + $0x388] sm:$0xff] }
 0x1c1   :  { %v1227_v16 = vclamps-f32 %v162_v13, 1.0  ;;  %606 = vmatpush.msrb.mxu2 %v1259_v56  ;;  %589 = vmatpush.msrb.mxu1 %v1284_v9  ;;  %v1251_v13 = vld [vmem:[%s2346_s2 + $0x288] sm:$0xff]  ;;  %v390_v56 = vperm.slane %v1230_v49, 0 }
 0x1c2   :  { %v1228_v17 = vclamps-f32 %v202_v15, 1.0  ;;  %567 = vmatpush.msrb.mxu0 %v1256_v58  ;;  %629 = vmatpush.msrb.mxu3 %v1285_v42  ;;  %v1248_v15 = vld [vmem:[%s2346_s2 + $0x270] sm:$0xff]  ;;  %v1267_v54 = vld [vmem:[%s2346_s2 + $0x308] sm:$0xff] }
 0x1c3   :  { %v205_v19 = vadd.f32 1.0, %v1227_v16  ;;  %607 = vmatpush.msrb.mxu2 %v1257_v60  ;;  %v1280_v16 = vld [vmem:[%s2346_s2 + $0x370] sm:$0xff]  ;;  %590 = vmatpush.msrb.mxu1 %v1282_v12 }
 0x1c4   :  { %v206_v7 = vadd.f32 1.0, %v1228_v17  ;;  %568 = vmatpush.msrb.mxu0 %v1254_v62  ;;  %v1249_v17 = vld [vmem:[%s2346_s2 + $0x278] sm:$0xff]  ;;  %630 = vmatpush.msrb.mxu3 %v1283_v14  ;;  %v398_v62 = vperm.slane %v1231_v55, 1 }
 0x1c5   :  { %v207_v21 = vmul.f32 %v205_v19, %v121_v18  ;;  %608 = vmatpush.msrb.mxu2 %v1255_v1  ;;  %v1281_v18 = vld [vmem:[%s2346_s2 + $0x378] sm:$0xff]  ;;  %v1246_v19 = vld [vmem:[%s2346_s2 + $0x260] sm:$0xff]  ;;  %591 = vmatpush.msrb.mxu1 %v1280_v16 }
 0x1c6   :  { %v208_v22 = vmul.f32 %v206_v7, %v122_v20  ;;  %569 = vmatpush.msrb.mxu0 %v1252_v4  ;;  %v1278_v20 = vld [vmem:[%s2346_s2 + $0x360] sm:$0xff]  ;;  %v1247_v7 = vld [vmem:[%s2346_s2 + $0x268] sm:$0xff]  ;;  %631 = vmatpush.msrb.mxu3 %v1281_v18 }
 0x1c7   :  { %296 = vmatmul.f32.vlgmr.msra.gmra.mxu0 %v207_v21  ;;  %336 = vmatmul.f32.vlgmr.msra.gmra.mxu2 %v207_v21  ;;  %v1279_v21 = vld [vmem:[%s2346_s2 + $0x368] sm:$0xff] }
 0x1c8   :  { %316 = vmatmul.f32.vlgmr.msra.gmra.mxu1 %v208_v22  ;;  %356 = vmatmul.f32.vlgmr.msra.gmra.mxu3 %v208_v22  ;;  %v1244_v22 = vld [vmem:[%s2346_s2 + $0x250] sm:$0xff] }
 0x1c9   :  { %609 = vmatpush.msrb.mxu2 %v1253_v41  ;;  %570 = vmatpush.msrb.mxu0 %v1250_v11 }
 0x1ca   :  { %592 = vmatpush.msrb.mxu1 %v1278_v20  ;;  %632 = vmatpush.msrb.mxu3 %v1279_v21 }
 0x1cb   :  { %610 = vmatpush.msrb.mxu2 %v1251_v13  ;;  %571 = vmatpush.msrb.mxu0 %v1248_v15 }
 0x1cc   :  { %593 = vmatpush.msrb.mxu1 %v1276_v8 }
 0x1cd   :  { %611 = vmatpush.msrb.mxu2 %v1249_v17  ;;  %572 = vmatpush.msrb.mxu0 %v1246_v19 }
 0x1cf   :  { %612 = vmatpush.msrb.mxu2 %v1247_v7  ;;  %573 = vmatpush.msrb.mxu0 %v1244_v22 }
 0x244   :  { %v297_v24 = vpop.f32.mrf.mxu0 }
 0x245   :  { %v298_v26 = vadd.f32 %v297_v24, %v276_v23  ;;  %v317_v28 = vpop.f32.mrf.mxu1  ;;  %v1245_v23 = vld [vmem:[%s2346_s2 + $0x258] sm:$0xff] }
 0x246   :  { %v1277_v24 = vld [vmem:[%s2346_s2 + $0x358] sm:$0xff]  ;;  %613 = vmatpush.msrb.mxu2 %v1245_v23 }
 0x247   :  { %v318_v6 = vadd.f32 %v317_v28, %v298_v26  ;;  %v1242_v26 = vld [vmem:[%s2346_s2 + $0x240] sm:$0xff]  ;;  %v1243_v28 = vld [vmem:[%s2346_s2 + $0x248] sm:$0xff]  ;;  %633 = vmatpush.msrb.mxu3 %v1277_v24 }
 0x248   :  { %574 = vmatpush.msrb.mxu0 %v1242_v26  ;;  %614 = vmatpush.msrb.mxu2 %v1243_v28 }
 0x24a   :  { %v337_v27 = vpop.f32.mrf.mxu2 }
 0x24b   :  { %v338_v5 = vadd.f32 %v337_v27, %v277_v25  ;;  %v357_v29 = vpop.f32.mrf.mxu3  ;;  %v1274_v27 = vld [vmem:[%s2346_s2 + $0x340] sm:$0xff] }
 0x24c   :  { %594 = vmatpush.msrb.mxu1 %v1274_v27 }
 0x24d   :  { %v358_v30 = vadd.f32 %v357_v29, %v338_v5  ;;  %v1275_v29 = vld [vmem:[%s2346_s2 + $0x348] sm:$0xff] }
 0x24e   :  { %634 = vmatpush.msrb.mxu3 %v1275_v29 }
 0x24f   :  { %v364_v31 = vadd.f32 %v358_v30, %v318_v6 }
 0x251   :  { %365 = vadd.xlane.f32.xlu2 %v364_v31 }
 0x2c4   :  { %v366_v32 = vpop.xlane.xlu2 %365 }
 0x2c5   :  { %v367_v33 = vmul.f32 %v366_v32, %v1487_v38  ;;  %v1241_v32 = vld [vmem:[%s2346_s2 + $0x238] sm:$0xff] }
 0x2c6   :  { %615 = vmatpush.msrb.mxu2 %v1241_v32 }
 0x2c7   :  { %v1727_v34 = vsub.f32 %v318_v6, %v367_v33  ;;  %v1729_v35 = vsub.f32 %v358_v30, %v367_v33  ;;  %v1240_v6 = vld [vmem:[%s2346_s2 + $0x230] sm:$0xff]  ;;  %v1273_v33 = vld [vmem:[%s2346_s2 + $0x338] sm:$0xff] }
 0x2c8   :  { %v1272_v30 = vld [vmem:[%s2346_s2 + $0x330] sm:$0xff]  ;;  %575 = vmatpush.msrb.mxu0 %v1240_v6  ;;  %635 = vmatpush.msrb.mxu3 %v1273_v33 }
 0x2c9   :  { %v370_v36 = vmul.f32 %v1727_v34, %v1727_v34  ;;  %v371_v37 = vmul.f32 %v1729_v35, %v1729_v35  ;;  %595 = vmatpush.msrb.mxu1 %v1272_v30  ;;  %616 = vmatpush.msrb.mxu2 %v1239_v40 }
 0x2ca   :  { %636 = vmatpush.msrb.mxu3 %v1271_v43 }
 0x2cb   :  { %v372_v39 = vadd.f32 %v371_v37, %v370_v36  ;;  %v1238_v36 = vld [vmem:[%s2346_s2 + $0x220] sm:$0xff]  ;;  %617 = vmatpush.msrb.mxu2 %v1237_v47 }
 0x2cc   :  { %v1270_v37 = vld [vmem:[%s2346_s2 + $0x320] sm:$0xff]  ;;  %576 = vmatpush.msrb.mxu0 %v1238_v36  ;;  %637 = vmatpush.msrb.mxu3 %v1269_v48 }
 0x2cd   :  { %373 = vadd.xlane.f32.xlu2 %v372_v39  ;;  %596 = vmatpush.msrb.mxu1 %v1270_v37 }
 0x2ce   :  { %577 = vmatpush.msrb.mxu0 %v1236_v44  ;;  %618 = vmatpush.msrb.mxu2 %v1235_v53 }
 0x2cf   :  { %597 = vmatpush.msrb.mxu1 %v1268_v45  ;;  %638 = vmatpush.msrb.mxu3 %v1267_v54 }
 0x2d0   :  { %578 = vmatpush.msrb.mxu0 %v1234_v50 }
 0x2d1   :  { %598 = vmatpush.msrb.mxu1 %v1266_v51 }
 0x340   :  { %v374_v0 = vpop.xlane.xlu2 %373 }
 0x341   :  { %v375_v3 = vmul.f32 %v374_v0, %v1487_v38 }
 0x343   :  { %v1820_v10 = vadd.f32 1e-05, %v375_v3 }
 0x345   :  { %1391 = vrsqrt.f32 %v1820_v10  ;;  %vm383_vm13 = vweird.f32 %v1820_v10 }
 0x34b   :  { %v1392_v25 = vpop.eup %1391 }
 0x34c   :  { %v378_v5 = vmul.f32 %v1392_v25, %v1820_v10  ;;  %vm384_vm12 = vweird.f32 %v1392_v25 }
 0x34d   :  { %vm385_vm14 = vmor %vm383_vm13, %vm384_vm12 }
 0x34e   :  { %v379_v31 = vmul.f32 %v1392_v25, %v378_v5 }
 0x350   :  { %v380_v39 = vmul.f32 0.5, %v379_v31 }
 0x352   :  { %v381_v46 = vsub.f32 1.5, %v380_v39 }
 0x354   :  { %v382_v52 = vmul.f32 %v1392_v25, %v381_v46 }
 0x356   :  { %v386_v58 = vsel %vm385_vm14, %v1392_v25, %v382_v52 }
 0x357   :  { %v387_v59 = vmul.f32 %v386_v58, %v1727_v34  ;;  %v388_v60 = vmul.f32 %v386_v58, %v1729_v35 }
 0x359   :  { %v394_v63 = vmul.f32 %v390_v56, %v387_v59  ;;  %v395_v0 = vmul.f32 %v391_v57, %v388_v60 }
 0x35b   :  { %v1942_v1 = vadd.f32 %v397_v61, %v394_v63  ;;  %v1944_v2 = vadd.f32 %v398_v62, %v395_v0 }
 0x35d   :  { %v1947_v3 = vmul.f32 0.70710677, %v1942_v1  ;;  %v1950_v4 = vmul.f32 0.70710677, %v1944_v2 }
 0x35f   :  { %v407_v34 = vmul.f32 %v1947_v3, %v1947_v3  ;;  %v447_v35 = vmul.f32 %v1950_v4, %v1950_v4 }
 0x361   :  { %v408_v9 = vmin.f32 %v407_v34, 16.0  ;;  %v448_v41 = vmin.f32 %v447_v35, 16.0 }
 0x363   :  { %v409_v42 = vmul.f32 2.1237322e-06, %v408_v9  ;;  %v420_v10 = vmul.f32 3.8918573e-05, %v408_v9  ;;  %v449_v11 = vmul.f32 2.1237322e-06, %v448_v41 }
 0x364   :  { %v460_v12 = vmul.f32 3.8918573e-05, %v448_v41 }
 0x365   :  { %v410_v13 = vadd.f32 0.00028619796, %v409_v42  ;;  %v421_v14 = vadd.f32 0.001143296, %v420_v10  ;;  %v450_v15 = vadd.f32 0.00028619796, %v449_v11 }
 0x366   :  { %v461_v16 = vadd.f32 0.001143296, %v460_v12 }
 0x367   :  { %v411_v17 = vmul.f32 %v410_v13, %v408_v9  ;;  %v422_v18 = vmul.f32 %v421_v14, %v408_v9  ;;  %v451_v19 = vmul.f32 %v450_v15, %v448_v41 }
 0x368   :  { %v462_v20 = vmul.f32 %v461_v16, %v448_v41  ;;  %v403_v16 = vmul.f32 0.5, %v1942_v1 }
 0x369   :  { %v412_v7 = vadd.f32 0.0036580483, %v411_v17  ;;  %v423_v21 = vadd.f32 0.014752088, %v422_v18  ;;  %v452_v23 = vadd.f32 0.0036580483, %v451_v19 }
 0x36a   :  { %v463_v22 = vadd.f32 0.014752088, %v462_v20  ;;  %v404_v18 = vmul.f32 0.5, %v1944_v2 }
 0x36b   :  { %v424_v8 = vmul.f32 %v423_v21, %v408_v9  ;;  %v413_v25 = vmul.f32 %v412_v7, %v408_v9  ;;  %v453_v28 = vmul.f32 %v452_v23, %v448_v41 }
 0x36c   :  { %v464_v24 = vmul.f32 %v463_v22, %v448_v41 }
 0x36d   :  { %v425_v26 = vadd.f32 0.112945676, %v424_v8  ;;  %v414_v6 = vadd.f32 0.05243302, %v413_v25  ;;  %v454_v33 = vadd.f32 0.05243302, %v453_v28 }
 0x36e   :  { %v465_v27 = vadd.f32 0.112945676, %v464_v24 }
 0x36f   :  { %v426_v5 = vmul.f32 %v425_v26, %v408_v9  ;;  %v415_v37 = vmul.f32 %v414_v6, %v408_v9  ;;  %v455_v43 = vmul.f32 %v454_v33, %v448_v41  ;;  %v1333_v33 = vld [vmem:[%s2346_s2 + $0x4f0] sm:$0xff] }
 0x370   :  { %v466_v29 = vmul.f32 %v465_v27, %v448_v41  ;;  %846 = vmatpush.msra.mxu0 %v1333_v33  ;;  %v1299_v33 = vld [vmem:[%s2345_s1 + $0x12] ss:$8 sm:$0x3] }
 0x371   :  { %v427_v30 = vadd.f32 0.4994258, %v426_v5  ;;  %v416_v44 = vadd.f32 0.18741608, %v415_v37  ;;  %v456_v45 = vadd.f32 0.18741608, %v455_v43 }
 0x372   :  { %v467_v31 = vadd.f32 0.4994258, %v466_v29  ;;  %v1334_v37 = vld [vmem:[%s2346_s2 + $0x4f8] sm:$0xff]  ;;  %v1363_v43 = vld [vmem:[%s2346_s2 + $0x5e0] sm:$0xff] }
 0x373   :  { %v428_v32 = vmul.f32 %v427_v30, %v408_v9  ;;  %v417_v47 = vmul.f32 %v416_v44, %v408_v9  ;;  %v457_v50 = vmul.f32 %v456_v45, %v448_v41  ;;  %886 = vmatpush.msra.mxu2 %v1334_v37  ;;  %v1332_v44 = vld [vmem:[%s2346_s2 + $0x4e8] sm:$0xff] }
 0x374   :  { %v468_v36 = vmul.f32 %v467_v31, %v448_v41  ;;  %v1364_v45 = vld [vmem:[%s2346_s2 + $0x5e8] sm:$0xff] }
 0x375   :  { %v429_v39 = vadd.f32 1.0, %v428_v32  ;;  %v418_v53 = vadd.f32 1.1283791, %v417_v47  ;;  %v458_v59 = vadd.f32 1.1283791, %v457_v50  ;;  %v1361_v47 = vld [vmem:[%s2346_s2 + $0x5d0] sm:$0xff]  ;;  %887 = vmatpush.msra.mxu2 %v1332_v44 }
 0x376   :  { %v469_v40 = vadd.f32 1.0, %v468_v36  ;;  %v1365_v36 = vld [vmem:[%s2346_s2 + $0x5f0] sm:$0xff]  ;;  %v1327_v50 = vld [vmem:[%s2346_s2 + $0x4c0] sm:$0xff]  ;;  %v1308_v37 = vld [vmem:[%s2346_s2 + $0x428] sm:$0xff] }
 0x377   :  { %1393 = vrcp.f32 %v429_v39  ;;  %v441_v54 = vand.u32 2147483648, %v429_v39  ;;  %v439_v57 = vand.u32 2147483647, %v429_v39  ;;  %vm435_vm1 = vweird.f32 %v429_v39  ;;  %866 = vmatpush.msra.mxu1 %v1365_v36 }
 0x378   :  { %1395 = vrcp.f32 %v469_v40  ;;  %v481_v58 = vand.u32 2147483648, %v469_v40  ;;  %v479_v61 = vand.u32 2147483647, %v469_v40  ;;  %vm475_vm3 = vweird.f32 %v469_v40 }
 0x379   :  { %v442_v63 = vor.u32 1.1754944e-38, %v441_v54  ;;  %v419_v34 = vmul.f32 %v418_v53, %v1947_v3  ;;  %vm440_vm4 = vcmp.eq.f32.partialorder %v439_v57, 8.507059e+37  ;;  %v459_v42 = vmul.f32 %v458_v59, %v1950_v4  ;;  %v1298_v4 = vld [vmem:[%s2345_s1 + $0x11] ss:$8 sm:$0x3]  ;;  %867 = vmatpush.msra.mxu1 %v1363_v43  ;;  %v1360_v53 = vld [vmem:[%s2346_s2 + $0x5c8] sm:$0xff] }
 0x37a   :  { %v482_v9 = vor.u32 1.1754944e-38, %v481_v58  ;;  %vm480_vm6 = vcmp.eq.f32.partialorder %v479_v61, 8.507059e+37  ;;  %v559_v7 = vperm.slane %v1298_v4, 0  ;;  %v560_v22 = vperm.slane %v1298_v4, 1  ;;  %v1325_v54 = vld [vmem:[%s2346_s2 + $0x4b0] sm:$0xff]  ;;  %v1326_v57 = vld [vmem:[%s2346_s2 + $0x4b8] sm:$0xff] }
 0x37b   :  { %868 = vmatpush.msra.mxu1 %v1361_v47  ;;  %v1358_v58 = vld [vmem:[%s2346_s2 + $0x5b8] sm:$0xff]  ;;  %v1355_v61 = vld [vmem:[%s2346_s2 + $0x5a0] sm:$0xff]  ;;  %v1313_v4 = vld [vmem:[%s2346_s2 + $0x450] sm:$0xff] }
 0x37c   :  { %v1337_v43 = vld [vmem:[%s2346_s2 + $0x510] sm:$0xff] }
 0x37d   :  { %v1394_v46 = vpop.eup %1393  ;;  %v1300_v47 = vld [vmem:[%s2345_s1 + $0x13] ss:$8 sm:$0x3] }
 0x37e   :  { %v1396_v48 = vpop.eup %1395  ;;  %v431_v49 = vmul.f32 %v1394_v46, %v429_v39  ;;  %vm436_vm15 = vweird.f32 %v1394_v46  ;;  %v1366_v39 = vld [vmem:[%s2346_s2 + $0x5f8] sm:$0xff] }
 0x37f   :  { %v471_v51 = vmul.f32 %v1396_v48, %v469_v40  ;;  %vm476_vm0 = vweird.f32 %v1396_v48  ;;  %vm437_vm2 = vmor %vm435_vm1, %vm436_vm15  ;;  %v1331_v40 = vld [vmem:[%s2346_s2 + $0x4e0] sm:$0xff]  ;;  %906 = vmatpush.msra.mxu3 %v1366_v39  ;;  %v1340_v39 = vld [vmem:[%s2346_s2 + $0x528] sm:$0xff] }
 0x380   :  { %v432_v52 = vsub.f32 1.0, %v431_v49  ;;  %vm477_vm5 = vmor %vm475_vm3, %vm476_vm0  ;;  %847 = vmatpush.msra.mxu0 %v1331_v40  ;;  %v1362_v49 = vld [vmem:[%s2346_s2 + $0x5d8] sm:$0xff]  ;;  %v1305_v40 = vld [vmem:[%s2346_s2 + $0x410] sm:$0xff] }
 0x381   :  { %v472_v55 = vsub.f32 1.0, %v471_v51  ;;  %907 = vmatpush.msra.mxu3 %v1364_v45  ;;  %v1359_v51 = vld [vmem:[%s2346_s2 + $0x5c0] sm:$0xff]  ;;  %v1306_v45 = vld [vmem:[%s2346_s2 + $0x418] sm:$0xff] }
 0x382   :  { %v433_v56 = vmul.f32 %v1394_v46, %v432_v52  ;;  %v1328_v52 = vld [vmem:[%s2346_s2 + $0x4c8] sm:$0xff]  ;;  %869 = vmatpush.msra.mxu1 %v1359_v51  ;;  %v1335_v51 = vld [vmem:[%s2346_s2 + $0x500] sm:$0xff] }
 0x383   :  { %v473_v60 = vmul.f32 %v1396_v48, %v472_v55  ;;  %908 = vmatpush.msra.mxu3 %v1362_v49  ;;  %v1357_v55 = vld [vmem:[%s2346_s2 + $0x5b0] sm:$0xff]  ;;  %v674_v49 = vperm.slane %v1299_v33, 1 }
 0x384   :  { %v434_v62 = vadd.f32 %v1394_v46, %v433_v56  ;;  %870 = vmatpush.msra.mxu1 %v1357_v55 }
 0x385   :  { %v474_v0 = vadd.f32 %v1396_v48, %v473_v60  ;;  %909 = vmatpush.msra.mxu3 %v1360_v53  ;;  %v1323_v60 = vld [vmem:[%s2346_s2 + $0x4a0] sm:$0xff]  ;;  %v1304_v53 = vld [vmem:[%s2346_s2 + $0x408] sm:$0xff] }
 0x386   :  { %v438_v35 = vsel %vm437_vm2, %v1394_v46, %v434_v62  ;;  %v1329_v46 = vld [vmem:[%s2346_s2 + $0x4d0] sm:$0xff]  ;;  %v1324_v62 = vld [vmem:[%s2346_s2 + $0x4a8] sm:$0xff]  ;;  %871 = vmatpush.msra.mxu1 %v1355_v61 }
 0x387   :  { %v443_v41 = vsel %vm440_vm4, %v442_v63, %v438_v35  ;;  %v478_v10 = vsel %vm477_vm5, %v1396_v48, %v474_v0  ;;  %v1330_v48 = vld [vmem:[%s2346_s2 + $0x4d8] sm:$0xff]  ;;  %848 = vmatpush.msra.mxu0 %v1329_v46  ;;  %v1356_v63 = vld [vmem:[%s2346_s2 + $0x5a8] sm:$0xff]  ;;  %910 = vmatpush.msra.mxu3 %v1358_v58  ;;  %v1353_v35 = vld [vmem:[%s2346_s2 + $0x590] sm:$0xff]  ;;  %v681_v58 = vperm.slane %v1300_v47, 1 }
 0x388   :  { %v444_v11 = vmul.f32 %v443_v41, %v419_v34  ;;  %v483_v12 = vsel %vm480_vm6, %v482_v9, %v478_v10  ;;  %888 = vmatpush.msra.mxu2 %v1330_v48  ;;  %v1321_v34 = vld [vmem:[%s2346_s2 + $0x490] sm:$0xff]  ;;  %v1322_v9 = vld [vmem:[%s2346_s2 + $0x498] sm:$0xff]  ;;  %v1351_v10 = vld [vmem:[%s2346_s2 + $0x580] sm:$0xff]  ;;  %872 = vmatpush.msra.mxu1 %v1353_v35  ;;  %v673_v48 = vperm.slane %v1299_v33, 0 }
 0x389   :  { %v484_v13 = vmul.f32 %v483_v12, %v459_v42  ;;  %849 = vmatpush.msra.mxu0 %v1327_v50  ;;  %v1354_v41 = vld [vmem:[%s2346_s2 + $0x598] sm:$0xff]  ;;  %911 = vmatpush.msra.mxu3 %v1356_v63  ;;  %v1319_v42 = vld [vmem:[%s2346_s2 + $0x480] sm:$0xff]  ;;  %v1352_v12 = vld [vmem:[%s2346_s2 + $0x588] sm:$0xff] }
 0x38a   :  { %v1232_v14 = vclamps-f32 %v444_v11, 1.0  ;;  %889 = vmatpush.msra.mxu2 %v1328_v52  ;;  %v1320_v11 = vld [vmem:[%s2346_s2 + $0x488] sm:$0xff]  ;;  %873 = vmatpush.msra.mxu1 %v1351_v10  ;;  %v1338_v46 = vld [vmem:[%s2346_s2 + $0x518] sm:$0xff]  ;;  %v1303_v50 = vld [vmem:[%s2346_s2 + $0x400] sm:$0xff] }
 0x38b   :  { %v1233_v15 = vclamps-f32 %v484_v13, 1.0  ;;  %850 = vmatpush.msra.mxu0 %v1325_v54  ;;  %912 = vmatpush.msra.mxu3 %v1354_v41  ;;  %v1317_v13 = vld [vmem:[%s2346_s2 + $0x470] sm:$0xff]  ;;  %v1336_v54 = vld [vmem:[%s2346_s2 + $0x508] sm:$0xff] }
 0x38c   :  { %v487_v17 = vadd.f32 1.0, %v1232_v14  ;;  %890 = vmatpush.msra.mxu2 %v1326_v57  ;;  %v1349_v14 = vld [vmem:[%s2346_s2 + $0x570] sm:$0xff]  ;;  %v680_v57 = vperm.slane %v1300_v47, 0 }
 0x38d   :  { %v488_v3 = vadd.f32 1.0, %v1233_v15  ;;  %851 = vmatpush.msra.mxu0 %v1323_v60  ;;  %v1318_v15 = vld [vmem:[%s2346_s2 + $0x478] sm:$0xff]  ;;  %913 = vmatpush.msra.mxu3 %v1352_v12 }
 0x38e   :  { %v489_v19 = vmul.f32 %v487_v17, %v403_v16  ;;  %891 = vmatpush.msra.mxu2 %v1324_v62  ;;  %v1350_v16 = vld [vmem:[%s2346_s2 + $0x578] sm:$0xff]  ;;  %v1315_v17 = vld [vmem:[%s2346_s2 + $0x460] sm:$0xff]  ;;  %874 = vmatpush.msra.mxu1 %v1349_v14 }
 0x38f   :  { %v490_v20 = vmul.f32 %v488_v3, %v404_v18  ;;  %852 = vmatpush.msra.mxu0 %v1321_v34  ;;  %v1347_v18 = vld [vmem:[%s2346_s2 + $0x560] sm:$0xff]  ;;  %v1316_v3 = vld [vmem:[%s2346_s2 + $0x468] sm:$0xff]  ;;  %914 = vmatpush.msra.mxu3 %v1350_v16 }
 0x390   :  { %579 = vmatmul.f32.vlgmr.msrb.gmra.mxu0 %v489_v19  ;;  %619 = vmatmul.f32.vlgmr.msrb.gmra.mxu2 %v489_v19  ;;  %v1348_v19 = vld [vmem:[%s2346_s2 + $0x568] sm:$0xff] }
 0x391   :  { %599 = vmatmul.f32.vlgmr.msrb.gmra.mxu1 %v490_v20  ;;  %639 = vmatmul.f32.vlgmr.msrb.gmra.mxu3 %v490_v20 }
 0x392   :  { %892 = vmatpush.msra.mxu2 %v1322_v9  ;;  %853 = vmatpush.msra.mxu0 %v1319_v42 }
 0x393   :  { %875 = vmatpush.msra.mxu1 %v1347_v18  ;;  %915 = vmatpush.msra.mxu3 %v1348_v19 }
 0x394   :  { %893 = vmatpush.msra.mxu2 %v1320_v11  ;;  %854 = vmatpush.msra.mxu0 %v1317_v13 }
 0x396   :  { %894 = vmatpush.msra.mxu2 %v1318_v15  ;;  %855 = vmatpush.msra.mxu0 %v1315_v17 }
 0x398   :  { %895 = vmatpush.msra.mxu2 %v1316_v3  ;;  %856 = vmatpush.msra.mxu0 %v1313_v4 }
 0x40d   :  { %v580_v21 = vpop.f32.mrf.mxu0 }
 0x40e   :  { %v581_v8 = vadd.f32 %v580_v21, %v559_v7  ;;  %v600_v24 = vpop.f32.mrf.mxu1  ;;  %v1345_v7 = vld [vmem:[%s2346_s2 + $0x550] sm:$0xff] }
 0x40f   :  { %876 = vmatpush.msra.mxu1 %v1345_v7 }
 0x410   :  { %v601_v2 = vadd.f32 %v600_v24, %v581_v8  ;;  %v1346_v8 = vld [vmem:[%s2346_s2 + $0x558] sm:$0xff] }
 0x411   :  { %916 = vmatpush.msra.mxu3 %v1346_v8 }
 0x413   :  { %v620_v23 = vpop.f32.mrf.mxu2 }
 0x414   :  { %v621_v1 = vadd.f32 %v620_v23, %v560_v22  ;;  %v640_v25 = vpop.f32.mrf.mxu3  ;;  %v1314_v22 = vld [vmem:[%s2346_s2 + $0x458] sm:$0xff]  ;;  %v1311_v23 = vld [vmem:[%s2346_s2 + $0x440] sm:$0xff] }
 0x415   :  { %896 = vmatpush.msra.mxu2 %v1314_v22  ;;  %857 = vmatpush.msra.mxu0 %v1311_v23 }
 0x416   :  { %v641_v26 = vadd.f32 %v640_v25, %v621_v1  ;;  %v1343_v1 = vld [vmem:[%s2346_s2 + $0x540] sm:$0xff]  ;;  %v1312_v25 = vld [vmem:[%s2346_s2 + $0x448] sm:$0xff] }
 0x417   :  { %877 = vmatpush.msra.mxu1 %v1343_v1  ;;  %897 = vmatpush.msra.mxu2 %v1312_v25 }
 0x418   :  { %v647_v27 = vadd.f32 %v641_v26, %v601_v2 }
 0x41a   :  { %648 = vadd.xlane.f32.xlu0 %v647_v27  ;;  %v1341_v27 = vld [vmem:[%s2346_s2 + $0x530] sm:$0xff] }
 0x41b   :  { %878 = vmatpush.msra.mxu1 %v1341_v27 }
 0x48d   :  { %v649_v5 = vpop.xlane.xlu0 %648 }
 0x48e   :  { %v650_v28 = vmul.f32 %v649_v5, %v1487_v38 }
 0x490   :  { %v1964_v29 = vsub.f32 %v601_v2, %v650_v28  ;;  %v1966_v6 = vsub.f32 %v641_v26, %v650_v28  ;;  %v1344_v2 = vld [vmem:[%s2346_s2 + $0x548] sm:$0xff]  ;;  %v1309_v26 = vld [vmem:[%s2346_s2 + $0x430] sm:$0xff]  ;;  %v1310_v28 = vld [vmem:[%s2346_s2 + $0x438] sm:$0xff] }
 0x491   :  { %917 = vmatpush.msra.mxu3 %v1344_v2  ;;  %858 = vmatpush.msra.mxu0 %v1309_v26 }
 0x492   :  { %v653_v30 = vmul.f32 %v1964_v29, %v1964_v29  ;;  %v654_v31 = vmul.f32 %v1966_v6, %v1966_v6  ;;  %898 = vmatpush.msra.mxu2 %v1310_v28 }
 0x494   :  { %v655_v32 = vadd.f32 %v654_v31, %v653_v30  ;;  %v1342_v30 = vld [vmem:[%s2346_s2 + $0x538] sm:$0xff]  ;;  %v1307_v31 = vld [vmem:[%s2346_s2 + $0x420] sm:$0xff]  ;;  %899 = vmatpush.msra.mxu2 %v1308_v37 }
 0x495   :  { %918 = vmatpush.msra.mxu3 %v1342_v30  ;;  %859 = vmatpush.msra.mxu0 %v1307_v31 }
 0x496   :  { %656 = vadd.xlane.f32.xlu2 %v655_v32  ;;  %v1339_v32 = vld [vmem:[%s2346_s2 + $0x520] sm:$0xff]  ;;  %900 = vmatpush.msra.mxu2 %v1306_v45 }
 0x497   :  { %879 = vmatpush.msra.mxu1 %v1339_v32  ;;  %919 = vmatpush.msra.mxu3 %v1340_v39 }
 0x498   :  { %860 = vmatpush.msra.mxu0 %v1305_v40  ;;  %901 = vmatpush.msra.mxu2 %v1304_v53 }
 0x499   :  { %880 = vmatpush.msra.mxu1 %v1337_v43  ;;  %920 = vmatpush.msra.mxu3 %v1338_v46 }
 0x49a   :  { %861 = vmatpush.msra.mxu0 %v1303_v50 }
 0x49b   :  { %881 = vmatpush.msra.mxu1 %v1335_v51  ;;  %921 = vmatpush.msra.mxu3 %v1336_v54 }
 0x509   :  { %v657_v56 = vpop.xlane.xlu2 %656 }
 0x50a   :  { %v658_v59 = vmul.f32 %v657_v56, %v1487_v38 }
 0x50c   :  { %v2045_v0 = vadd.f32 1e-05, %v658_v59 }
 0x50e   :  { %1397 = vrsqrt.f32 %v2045_v0  ;;  %vm666_vm8 = vweird.f32 %v2045_v0 }
 0x514   :  { %v1398_v20 = vpop.eup %1397 }
 0x515   :  { %v661_v21 = vmul.f32 %v1398_v20, %v2045_v0  ;;  %vm667_vm7 = vweird.f32 %v1398_v20 }
 0x516   :  { %vm668_vm9 = vmor %vm666_vm8, %vm667_vm7 }
 0x517   :  { %v662_v24 = vmul.f32 %v1398_v20, %v661_v21 }
 0x519   :  { %v663_v5 = vmul.f32 0.5, %v662_v24 }
 0x51b   :  { %v664_v36 = vsub.f32 1.5, %v663_v5 }
 0x51d   :  { %v665_v44 = vmul.f32 %v1398_v20, %v664_v36 }
 0x51f   :  { %v669_v52 = vsel %vm668_vm9, %v1398_v20, %v665_v44 }
 0x520   :  { %v670_v55 = vmul.f32 %v669_v52, %v1964_v29  ;;  %v671_v56 = vmul.f32 %v669_v52, %v1966_v6 }
 0x522   :  { %v677_v59 = vmul.f32 %v673_v48, %v670_v55  ;;  %v678_v60 = vmul.f32 %v674_v49, %v671_v56 }
 0x524   :  { %v2179_v61 = vadd.f32 %v680_v57, %v677_v59  ;;  %v2181_v62 = vadd.f32 %v681_v58, %v678_v60 }
 0x526   :  { %v2184_v63 = vmul.f32 0.70710677, %v2179_v61  ;;  %v2187_v29 = vmul.f32 0.70710677, %v2181_v62 }
 0x528   :  { %v690_v6 = vmul.f32 %v2184_v63, %v2184_v63  ;;  %v730_v0 = vmul.f32 %v2187_v29, %v2187_v29 }
 0x52a   :  { %v691_v34 = vmin.f32 %v690_v6, 16.0  ;;  %v731_v35 = vmin.f32 %v730_v0, 16.0 }
 0x52c   :  { %v692_v9 = vmul.f32 2.1237322e-06, %v691_v34  ;;  %v703_v41 = vmul.f32 3.8918573e-05, %v691_v34  ;;  %v732_v42 = vmul.f32 2.1237322e-06, %v731_v35 }
 0x52d   :  { %v743_v10 = vmul.f32 3.8918573e-05, %v731_v35 }
 0x52e   :  { %v693_v11 = vadd.f32 0.00028619796, %v692_v9  ;;  %v704_v12 = vadd.f32 0.001143296, %v703_v41  ;;  %v733_v13 = vadd.f32 0.00028619796, %v732_v42 }
 0x52f   :  { %v744_v14 = vadd.f32 0.001143296, %v743_v10 }
 0x530   :  { %v694_v15 = vmul.f32 %v693_v11, %v691_v34  ;;  %v705_v16 = vmul.f32 %v704_v12, %v691_v34  ;;  %v734_v17 = vmul.f32 %v733_v13, %v731_v35 }
 0x531   :  { %v745_v18 = vmul.f32 %v744_v14, %v731_v35  ;;  %v686_v14 = vmul.f32 0.5, %v2179_v61 }
 0x532   :  { %v695_v3 = vadd.f32 0.0036580483, %v694_v15  ;;  %v706_v19 = vadd.f32 0.014752088, %v705_v16  ;;  %v735_v7 = vadd.f32 0.0036580483, %v734_v17 }
 0x533   :  { %v746_v20 = vadd.f32 0.014752088, %v745_v18  ;;  %v687_v16 = vmul.f32 0.5, %v2181_v62 }
 0x534   :  { %v707_v4 = vmul.f32 %v706_v19, %v691_v34  ;;  %v696_v22 = vmul.f32 %v695_v3, %v691_v34  ;;  %v736_v24 = vmul.f32 %v735_v7, %v731_v35 }
 0x535   :  { %v747_v21 = vmul.f32 %v746_v20, %v731_v35 }
 0x536   :  { %v708_v8 = vadd.f32 0.112945676, %v707_v4  ;;  %v697_v2 = vadd.f32 0.05243302, %v696_v22  ;;  %v737_v28 = vadd.f32 0.05243302, %v736_v24 }
 0x537   :  { %v748_v23 = vadd.f32 0.112945676, %v747_v21 }
 0x538   :  { %v709_v1 = vmul.f32 %v708_v8, %v691_v34  ;;  %v698_v31 = vmul.f32 %v697_v2, %v691_v34  ;;  %v738_v36 = vmul.f32 %v737_v28, %v731_v35  ;;  %v1072_v28 = vld [vmem:[%s2347_s3 + $0x78] sm:$0xff] }
 0x539   :  { %v749_v25 = vmul.f32 %v748_v23, %v731_v35  ;;  %1090 = vmatpush.msrb.mxu0 %v1072_v28 }
 0x53a   :  { %v710_v26 = vadd.f32 0.4994258, %v709_v1  ;;  %v699_v37 = vadd.f32 0.18741608, %v698_v31  ;;  %v739_v39 = vadd.f32 0.18741608, %v738_v36 }
 0x53b   :  { %v750_v27 = vadd.f32 0.4994258, %v749_v25  ;;  %v1071_v31 = vld [vmem:[%s2347_s3 + $0x70] sm:$0xff]  ;;  %v1086_v36 = vld [vmem:[%s2347_s3 + $0xe8] sm:$0xff] }
 0x53c   :  { %v711_v5 = vmul.f32 %v710_v26, %v691_v34  ;;  %v700_v43 = vmul.f32 %v699_v37, %v691_v34  ;;  %v740_v46 = vmul.f32 %v739_v39, %v731_v35  ;;  %1091 = vmatpush.msrb.mxu0 %v1071_v31  ;;  %v1069_v37 = vld [vmem:[%s2347_s3 + $0x60] sm:$0xff] }
 0x53d   :  { %v751_v30 = vmul.f32 %v750_v27, %v731_v35  ;;  %v1085_v39 = vld [vmem:[%s2347_s3 + $0xe0] sm:$0xff] }
 0x53e   :  { %v712_v32 = vadd.f32 1.0, %v711_v5  ;;  %v701_v49 = vadd.f32 1.1283791, %v700_v43  ;;  %v741_v55 = vadd.f32 1.1283791, %v740_v46  ;;  %v1084_v43 = vld [vmem:[%s2347_s3 + $0xd8] sm:$0xff] }
 0x53f   :  { %v752_v33 = vadd.f32 1.0, %v751_v30  ;;  %v1088_v30 = vld [vmem:[%s2347_s3 + $0xf8] sm:$0xff]  ;;  %v1067_v46 = vld [vmem:[%s2347_s3 + $0x50] sm:$0xff] }
 0x540   :  { %1399 = vrcp.f32 %v712_v32  ;;  %v724_v50 = vand.u32 2147483648, %v712_v32  ;;  %v722_v53 = vand.u32 2147483647, %v712_v32  ;;  %vm718_vm12 = vweird.f32 %v712_v32  ;;  %1110 = vmatpush.msrb.mxu1 %v1088_v30 }
 0x541   :  { %1401 = vrcp.f32 %v752_v33  ;;  %v764_v54 = vand.u32 2147483648, %v752_v33  ;;  %v762_v57 = vand.u32 2147483647, %v752_v33  ;;  %vm758_vm14 = vweird.f32 %v752_v33 }
 0x542   :  { %v725_v59 = vor.u32 1.1754944e-38, %v724_v50  ;;  %v702_v6 = vmul.f32 %v701_v49, %v2184_v63  ;;  %vm723_vm15 = vcmp.eq.f32.partialorder %v722_v53, 8.507059e+37  ;;  %v742_v9 = vmul.f32 %v741_v55, %v2187_v29  ;;  %v1367_v29 = vld [vmem:[%s2345_s1 + $0x14] ss:$8 sm:$0x3]  ;;  %v1066_v49 = vld [vmem:[%s2347_s3 + $0x48] sm:$0xff] }
 0x543   :  { %v765_v34 = vor.u32 1.1754944e-38, %v764_v54  ;;  %vm763_vm1 = vcmp.eq.f32.partialorder %v762_v57, 8.507059e+37  ;;  %v842_v3 = vperm.slane %v1367_v29, 0  ;;  %v843_v20 = vperm.slane %v1367_v29, 1  ;;  %v1082_v50 = vld [vmem:[%s2347_s3 + $0xc8] sm:$0xff]  ;;  %v1080_v53 = vld [vmem:[%s2347_s3 + $0xb8] sm:$0xff] }
 0x544   :  { %v1063_v54 = vld [vmem:[%s2347_s3 + $0x30] sm:$0xff]  ;;  %v1062_v57 = vld [vmem:[%s2347_s3 + $0x28] sm:$0xff] }
 0x545   :  { %v1079_v55 = vld [vmem:[%s2347_s3 + $0xb0] sm:$0xff] }
 0x546   :  { %v1400_v40 = vpop.eup %1399 }
 0x547   :  { %v1402_v44 = vpop.eup %1401  ;;  %v714_v45 = vmul.f32 %v1400_v40, %v712_v32  ;;  %vm719_vm10 = vweird.f32 %v1400_v40  ;;  %v1087_v32 = vld [vmem:[%s2347_s3 + $0xf0] sm:$0xff] }
 0x548   :  { %v754_v47 = vmul.f32 %v1402_v44, %v752_v33  ;;  %vm759_vm11 = vweird.f32 %v1402_v44  ;;  %vm720_vm13 = vmor %vm718_vm12, %vm719_vm10  ;;  %v1070_v33 = vld [vmem:[%s2347_s3 + $0x68] sm:$0xff]  ;;  %1111 = vmatpush.msrb.mxu1 %v1087_v32 }
 0x549   :  { %v715_v48 = vsub.f32 1.0, %v714_v45  ;;  %vm760_vm0 = vmor %vm758_vm14, %vm759_vm11  ;;  %1092 = vmatpush.msrb.mxu0 %v1070_v33 }
 0x54a   :  { %v755_v51 = vsub.f32 1.0, %v754_v47  ;;  %1112 = vmatpush.msrb.mxu1 %v1086_v36  ;;  %v1083_v47 = vld [vmem:[%s2347_s3 + $0xd0] sm:$0xff] }
 0x54b   :  { %v716_v52 = vmul.f32 %v1400_v40, %v715_v48  ;;  %1093 = vmatpush.msrb.mxu0 %v1069_v37 }
 0x54c   :  { %v756_v56 = vmul.f32 %v1402_v44, %v755_v51  ;;  %1113 = vmatpush.msrb.mxu1 %v1085_v39  ;;  %v1081_v51 = vld [vmem:[%s2347_s3 + $0xc0] sm:$0xff] }
 0x54d   :  { %v717_v58 = vadd.f32 %v1400_v40, %v716_v52  ;;  %v1064_v52 = vld [vmem:[%s2347_s3 + $0x38] sm:$0xff] }
 0x54e   :  { %v757_v60 = vadd.f32 %v1402_v44, %v756_v56  ;;  %1114 = vmatpush.msrb.mxu1 %v1084_v43 }
 0x54f   :  { %v721_v0 = vsel %vm720_vm13, %v1400_v40, %v717_v58  ;;  %v1068_v40 = vld [vmem:[%s2347_s3 + $0x58] sm:$0xff]  ;;  %v1078_v58 = vld [vmem:[%s2347_s3 + $0xa8] sm:$0xff] }
 0x550   :  { %v726_v35 = vsel %vm723_vm15, %v725_v59, %v721_v0  ;;  %v761_v41 = vsel %vm760_vm0, %v1402_v44, %v757_v60  ;;  %1094 = vmatpush.msrb.mxu0 %v1068_v40  ;;  %1115 = vmatpush.msrb.mxu1 %v1083_v47  ;;  %v1061_v60 = vld [vmem:[%s2347_s3 + $0x20] sm:$0xff] }
 0x551   :  { %v727_v42 = vmul.f32 %v726_v35, %v702_v6  ;;  %v766_v10 = vsel %vm763_vm1, %v765_v34, %v761_v41  ;;  %v1077_v6 = vld [vmem:[%s2347_s3 + $0xa0] sm:$0xff]  ;;  %v1060_v34 = vld [vmem:[%s2347_s3 + $0x18] sm:$0xff]  ;;  %v1059_v41 = vld [vmem:[%s2347_s3 + $0x10] sm:$0xff] }
 0x552   :  { %v767_v11 = vmul.f32 %v766_v10, %v742_v9  ;;  %1095 = vmatpush.msrb.mxu0 %v1067_v46  ;;  %1116 = vmatpush.msrb.mxu1 %v1082_v50  ;;  %v1076_v35 = vld [vmem:[%s2347_s3 + $0x98] sm:$0xff] }
 0x553   :  { %v1301_v12 = vclamps-f32 %v727_v42, 1.0  ;;  %v1075_v42 = vld [vmem:[%s2347_s3 + $0x90] sm:$0xff] }
 0x554   :  { %v1302_v13 = vclamps-f32 %v767_v11, 1.0  ;;  %1096 = vmatpush.msrb.mxu0 %v1066_v49  ;;  %1117 = vmatpush.msrb.mxu1 %v1081_v51  ;;  %v1368_v10 = vld [vmem:[%s2345_s1 + $0x15] ss:$8 sm:$0x3] }
 0x555   :  { %v770_v15 = vadd.f32 1.0, %v1301_v12  ;;  %v1058_v12 = vld [vmem:[%s2347_s3 + $0x8] sm:$0xff] }
 0x556   :  { %v771_v63 = vadd.f32 1.0, %v1302_v13  ;;  %1118 = vmatpush.msrb.mxu1 %v1080_v53  ;;  %v1074_v13 = vld [vmem:[%s2347_s3 + $0x88] sm:$0xff] }
 0x557   :  { %v772_v17 = vmul.f32 %v770_v15, %v686_v14  ;;  %v1369_v15 = vld [vmem:[%s2345_s1 + $0x16] ss:$8 sm:$0x3] }
 0x558   :  { %v773_v18 = vmul.f32 %v771_v63, %v687_v16  ;;  %1119 = vmatpush.msrb.mxu1 %v1079_v55  ;;  %v956_v16 = vperm.slane %v1368_v10, 0  ;;  %v957_v63 = vperm.slane %v1368_v10, 1 }
 0x559   :  { %862 = vmatmul.f32.vlgmr.msra.gmra.mxu0 %v772_v17  ;;  %902 = vmatmul.f32.vlgmr.msra.gmra.mxu2 %v772_v17  ;;  %v1057_v17 = vld [vmem:[%s2347_s3] sm:$0xff] }
 0x55a   :  { %882 = vmatmul.f32.vlgmr.msra.gmra.mxu1 %v773_v18  ;;  %922 = vmatmul.f32.vlgmr.msra.gmra.mxu3 %v773_v18  ;;  %v1073_v18 = vld [vmem:[%s2347_s3 + $0x80] sm:$0xff] }
 0x55b   :  { %1120 = vmatpush.msrb.mxu1 %v1078_v58 }
 0x55d   :  { %1121 = vmatpush.msrb.mxu1 %v1077_v6 }
 0x55f   :  { %1122 = vmatpush.msrb.mxu1 %v1076_v35 }
 0x561   :  { %1123 = vmatpush.msrb.mxu1 %v1075_v42 }
 0x563   :  { %1124 = vmatpush.msrb.mxu1 %v1074_v13 }
 0x565   :  { %1125 = vmatpush.msrb.mxu1 %v1073_v18 }
 0x5d6   :  { %v863_v19 = vpop.f32.mrf.mxu0 }
 0x5d7   :  { %v864_v4 = vadd.f32 %v863_v19, %v842_v3  ;;  %v883_v21 = vpop.f32.mrf.mxu1 }
 0x5d9   :  { %v884_v62 = vadd.f32 %v883_v21, %v864_v4  ;;  %v964_v4 = vperm.slane %v1369_v15, 1 }
 0x5dc   :  { %v903_v7 = vpop.f32.mrf.mxu2 }
 0x5dd   :  { %v904_v61 = vadd.f32 %v903_v7, %v843_v20  ;;  %v923_v22 = vpop.f32.mrf.mxu3  ;;  %v963_v20 = vperm.slane %v1369_v15, 0 }
 0x5df   :  { %v924_v8 = vadd.f32 %v923_v22, %v904_v61 }
 0x5e1   :  { %v930_v23 = vadd.f32 %v924_v8, %v884_v62 }
 0x5e3   :  { %931 = vadd.xlane.f32.xlu2 %v930_v23 }
 0x656   :  { %v932_v1 = vpop.xlane.xlu2 %931 }
 0x657   :  { %v933_v24 = vmul.f32 %v932_v1, %v1487_v38 }
 0x659   :  { %v2201_v25 = vsub.f32 %v884_v62, %v933_v24  ;;  %v2203_v2 = vsub.f32 %v924_v8, %v933_v24 }
 0x65b   :  { %v936_v26 = vmul.f32 %v2201_v25, %v2201_v25  ;;  %v937_v27 = vmul.f32 %v2203_v2, %v2203_v2 }
 0x65d   :  { %v938_v5 = vadd.f32 %v937_v27, %v936_v26 }
 0x65f   :  { %939 = vadd.xlane.f32.xlu2 %v938_v5 }
 0x6d2   :  { %v940_v44 = vpop.xlane.xlu2 %939 }
 0x6d3   :  { %v941_v45 = vmul.f32 %v940_v44, %v1487_v38  ;;  %v1065_v38 = vld [vmem:[%s2347_s3 + $0x40] sm:$0xff] }
 0x6d4   :  { %1097 = vmatpush.msrb.mxu0 %v1065_v38 }
 0x6d5   :  { %v942_v48 = vadd.f32 1e-05, %v941_v45 }
 0x6d6   :  { %1098 = vmatpush.msrb.mxu0 %v1064_v52 }
 0x6d7   :  { %1403 = vrsqrt.f32 %v942_v48  ;;  %vm949_vm3 = vweird.f32 %v942_v48 }
 0x6d8   :  { %1099 = vmatpush.msrb.mxu0 %v1063_v54 }
 0x6da   :  { %1100 = vmatpush.msrb.mxu0 %v1062_v57 }
 0x6dc   :  { %1101 = vmatpush.msrb.mxu0 %v1061_v60 }
 0x6dd   :  { %v1404_v56 = vpop.eup %1403 }
 0x6de   :  { %v944_v59 = vmul.f32 %v1404_v56, %v942_v48  ;;  %vm950_vm2 = vweird.f32 %v1404_v56  ;;  %1102 = vmatpush.msrb.mxu0 %v1060_v34 }
 0x6df   :  { %vm951_vm4 = vmor %vm949_vm3, %vm950_vm2 }
 0x6e0   :  { %v945_v0 = vmul.f32 %v1404_v56, %v944_v59  ;;  %1103 = vmatpush.msrb.mxu0 %v1059_v41 }
 0x6e2   :  { %v946_v9 = vmul.f32 0.5, %v945_v0  ;;  %1104 = vmatpush.msrb.mxu0 %v1058_v12 }
 0x6e4   :  { %v947_v11 = vsub.f32 1.5, %v946_v9  ;;  %1105 = vmatpush.msrb.mxu0 %v1057_v17 }
 0x6e6   :  { %v948_v14 = vmul.f32 %v1404_v56, %v947_v11 }
 0x6e8   :  { %v952_v29 = vsel %vm951_vm4, %v1404_v56, %v948_v14 }
 0x6e9   :  { %v953_v3 = vmul.f32 %v952_v29, %v2201_v25  ;;  %v954_v19 = vmul.f32 %v952_v29, %v2203_v2 }
 0x6eb   :  { %v960_v7 = vmul.f32 %v956_v16, %v953_v3  ;;  %v961_v61 = vmul.f32 %v957_v63, %v954_v19 }
 0x6ed   :  { %v2314_v21 = vadd.f32 %v963_v20, %v960_v7  ;;  %v2316_v22 = vadd.f32 %v964_v4, %v961_v61 }
 0x6ef   :  { %v2319_v62 = vmul.f32 0.70710677, %v2314_v21  ;;  %v2322_v8 = vmul.f32 0.70710677, %v2316_v22 }
 0x6f1   :  { %v973_v23 = vmul.f32 %v2319_v62, %v2319_v62  ;;  %v1013_v1 = vmul.f32 %v2322_v8, %v2322_v8 }
 0x6f3   :  { %v974_v24 = vmin.f32 %v973_v23, 16.0  ;;  %v1014_v25 = vmin.f32 %v1013_v1, 16.0 }
 0x6f5   :  { %v975_v2 = vmul.f32 2.1237322e-06, %v974_v24  ;;  %v986_v26 = vmul.f32 3.8918573e-05, %v974_v24  ;;  %v1015_v27 = vmul.f32 2.1237322e-06, %v1014_v25 }
 0x6f6   :  { %v1026_v5 = vmul.f32 3.8918573e-05, %v1014_v25 }
 0x6f7   :  { %v976_v28 = vadd.f32 0.00028619796, %v975_v2  ;;  %v987_v30 = vadd.f32 0.001143296, %v986_v26  ;;  %v1016_v31 = vadd.f32 0.00028619796, %v1015_v27 }
 0x6f8   :  { %v1027_v32 = vadd.f32 0.001143296, %v1026_v5 }
 0x6f9   :  { %v977_v33 = vmul.f32 %v976_v28, %v974_v24  ;;  %v988_v36 = vmul.f32 %v987_v30, %v974_v24  ;;  %v1017_v37 = vmul.f32 %v1016_v31, %v1014_v25  ;;  %v969_v31 = vmul.f32 0.5, %v2314_v21 }
 0x6fa   :  { %v1028_v39 = vmul.f32 %v1027_v32, %v1014_v25 }
 0x6fb   :  { %v978_v40 = vadd.f32 0.0036580483, %v977_v33  ;;  %v989_v43 = vadd.f32 0.014752088, %v988_v36  ;;  %v1018_v46 = vadd.f32 0.0036580483, %v1017_v37 }
 0x6fc   :  { %v1029_v44 = vadd.f32 0.014752088, %v1028_v39  ;;  %v970_v33 = vmul.f32 0.5, %v2316_v22 }
 0x6fd   :  { %v990_v45 = vmul.f32 %v989_v43, %v974_v24  ;;  %v979_v48 = vmul.f32 %v978_v40, %v974_v24  ;;  %v1019_v51 = vmul.f32 %v1018_v46, %v1014_v25 }
 0x6fe   :  { %v1030_v47 = vmul.f32 %v1029_v44, %v1014_v25 }
 0x6ff   :  { %v991_v49 = vadd.f32 0.112945676, %v990_v45  ;;  %v980_v53 = vadd.f32 0.05243302, %v979_v48  ;;  %v1020_v57 = vadd.f32 0.05243302, %v1019_v51 }
 0x700   :  { %v1031_v50 = vadd.f32 0.112945676, %v1030_v47  ;;  %v1445_v45 = vmov 128.0  }
 0x701   :  { %v992_v38 = vmul.f32 %v991_v49, %v974_v24  ;;  %v981_v59 = vmul.f32 %v980_v53, %v974_v24  ;;  %v1021_v0 = vmul.f32 %v1020_v57, %v1014_v25 }
 0x702   :  { %v1032_v52 = vmul.f32 %v1031_v50, %v1014_v25 }
 0x703   :  { %v993_v54 = vadd.f32 0.4994258, %v992_v38  ;;  %v982_v34 = vadd.f32 0.18741608, %v981_v59  ;;  %v1022_v35 = vadd.f32 0.18741608, %v1021_v0 }
 0x704   :  { %v1033_v55 = vadd.f32 0.4994258, %v1032_v52 }
 0x705   :  { %v994_v56 = vmul.f32 %v993_v54, %v974_v24  ;;  %v983_v41 = vmul.f32 %v982_v34, %v974_v24  ;;  %v1023_v11 = vmul.f32 %v1022_v35, %v1014_v25  ;;  %v1130_v34 = vld [vmem:[%s2345_s1 + $0x20] ss:$0 sm:$0xff] }
 0x706   :  { %v1034_v58 = vmul.f32 %v1033_v55, %v1014_v25 }
 0x707   :  { %v995_v60 = vadd.f32 1.0, %v994_v56  ;;  %v984_v14 = vadd.f32 1.1283791, %v983_v41  ;;  %v1024_v29 = vadd.f32 1.1283791, %v1023_v11 }
 0x708   :  { %v1035_v6 = vadd.f32 1.0, %v1034_v58 }
 0x709   :  { %1405 = vrcp.f32 %v995_v60  ;;  %v1007_v15 = vand.u32 2147483648, %v995_v60  ;;  %v1005_v17 = vand.u32 2147483647, %v995_v60  ;;  %vm1001_vm7 = vweird.f32 %v995_v60 }
 0x70a   :  { %1407 = vrcp.f32 %v1035_v6  ;;  %v1047_v18 = vand.u32 2147483648, %v1035_v6  ;;  %v1045_v19 = vand.u32 2147483647, %v1035_v6  ;;  %vm1041_vm9 = vweird.f32 %v1035_v6 }
 0x70b   :  { %v1008_v4 = vor.u32 1.1754944e-38, %v1007_v15  ;;  %v985_v61 = vmul.f32 %v984_v14, %v2319_v62  ;;  %vm1006_vm10 = vcmp.eq.f32.partialorder %v1005_v17, 8.507059e+37  ;;  %v1025_v25 = vmul.f32 %v1024_v29, %v2322_v8  ;;  %v1089_v8 = vld [vmem:[%s2345_s1 + $0x17] ss:$0 sm:$0xff] }
 0x70c   :  { %v1048_v1 = vor.u32 1.1754944e-38, %v1047_v18  ;;  %vm1046_vm12 = vcmp.eq.f32.partialorder %v1045_v19, 8.507059e+37  ;;  %1409 = vrcp.f32 %v1445_v45 }
 0x70f   :  { %v1406_v9 = vpop.eup %1405 }
 0x710   :  { %v1408_v42 = vpop.eup %1407  ;;  %v997_v10 = vmul.f32 %v1406_v9, %v995_v60  ;;  %vm1002_vm5 = vweird.f32 %v1406_v9 }
 0x711   :  { %v1037_v12 = vmul.f32 %v1408_v42, %v1035_v6  ;;  %vm1042_vm6 = vweird.f32 %v1408_v42  ;;  %vm1003_vm8 = vmor %vm1001_vm7, %vm1002_vm5 }
 0x712   :  { %v998_v13 = vsub.f32 1.0, %v997_v10  ;;  %vm1043_vm11 = vmor %vm1041_vm9, %vm1042_vm6  ;;  %v1410_v21 = vpop.eup %1409 }
 0x713   :  { %v1038_v16 = vsub.f32 1.0, %v1037_v12  ;;  %v1135_v46 = vmul.f32 128.0, %v1410_v21  ;;  %vm1139_vm13 = vweird.f32 %v1410_v21 }
 0x714   :  { %v999_v63 = vmul.f32 %v1406_v9, %v998_v13 }
 0x715   :  { %v1039_v3 = vmul.f32 %v1408_v42, %v1038_v16  ;;  %v1136_v47 = vsub.f32 1.0, %v1135_v46 }
 0x716   :  { %v1000_v20 = vadd.f32 %v1406_v9, %v999_v63 }
 0x717   :  { %v1040_v7 = vadd.f32 %v1408_v42, %v1039_v3  ;;  %v1137_v22 = vmul.f32 %v1410_v21, %v1136_v47 }
 0x718   :  { %v1004_v23 = vsel %vm1003_vm8, %v1406_v9, %v1000_v20  ;;  %v1131_v9 = vld [vmem:[%s2345_s1 + $0x21] ss:$0 sm:$0xff]  ;;  %s1446_s1 = smov [#allocation2]  }
 0x719   :  { %v1009_v24 = vsel %vm1006_vm10, %v1008_v4, %v1004_v23  ;;  %v1044_v2 = vsel %vm1043_vm11, %v1408_v42, %v1040_v7  ;;  %v1138_v48 = vadd.f32 %v1410_v21, %v1137_v22  ;;  %s1211_s11 = sshll.u32 %s1446_s1, 4  ;;  %s1212_s11 = int_to_ptr.vmem [resolvable:$true] %s1211_s11 }
 0x71a   :  { %v1010_v26 = vmul.f32 %v1009_v24, %v985_v61  ;;  %v1049_v27 = vsel %vm1046_vm12, %v1048_v1, %v1044_v2 }
 0x71b   :  { %v1050_v5 = vmul.f32 %v1049_v27, %v1025_v25  ;;  %v1140_v49 = vsel %vm1139_vm13, %v1410_v21, %v1138_v48 }
 0x71c   :  { %v1370_v28 = vclamps-f32 %v1010_v26, 1.0 }
 0x71d   :  { %v1371_v30 = vclamps-f32 %v1050_v5, 1.0 }
 0x71e   :  { %v1053_v32 = vadd.f32 1.0, %v1370_v28 }
 0x71f   :  { %v1054_v62 = vadd.f32 1.0, %v1371_v30 }
 0x720   :  { %v1055_v36 = vmul.f32 %v1053_v32, %v969_v31 }
 0x721   :  { %v1056_v37 = vmul.f32 %v1054_v62, %v970_v33 }
 0x722   :  { %1106 = vmatmul.f32.vlgmr.msrb.gmra.mxu0 %v1055_v36 }
 0x723   :  { %1126 = vmatmul.f32.vlgmr.msrb.gmra.mxu1 %v1056_v37 }
 0x79f   :  { %v1107_v39 = vpop.f32.mrf.mxu0 }
 0x7a0   :  { %v1108_v40 = vadd.f32 %v1107_v39, %v1089_v8  ;;  %v1127_v43 = vpop.f32.mrf.mxu1 }
 0x7a2   :  { %v1128_v44 = vadd.f32 %v1127_v43, %v1108_v40 }
 0x7a4   :  { %1132 = vadd.xlane.f32.xlu2 %v1128_v44 }
 0x817   :  { %v1133_v50 = vpop.xlane.xlu2 %1132 }
 0x818   :  { %v1141_v38 = vmul.f32 %v1140_v49, %v1133_v50 }
 0x81a   :  { %v1142_v51 = vsub.f32 %v1128_v44, %v1141_v38 }
 0x81c   :  { %v1143_v52 = vmul.f32 %v1142_v51, %v1142_v51 }
 0x81e   :  { %1144 = vadd.xlane.f32.xlu1 %v1143_v52 }
 0x891   :  { %v1145_v53 = vpop.xlane.xlu1 %1144 }
 0x892   :  { %v1146_v54 = vmul.f32 %v1145_v53, %v1140_v49 }
 0x894   :  { %v1147_v55 = vadd.f32 1e-05, %v1146_v54 }
 0x896   :  { %1411 = vrsqrt.f32 %v1147_v55  ;;  %vm1154_vm15 = vweird.f32 %v1147_v55 }
 0x89c   :  { %v1412_v56 = vpop.eup %1411 }
 0x89d   :  { %v1149_v57 = vmul.f32 %v1412_v56, %v1147_v55  ;;  %vm1155_vm14 = vweird.f32 %v1412_v56 }
 0x89e   :  { %vm1156_vm0 = vmor %vm1154_vm15, %vm1155_vm14 }
 0x89f   :  { %v1150_v58 = vmul.f32 %v1412_v56, %v1149_v57 }
 0x8a1   :  { %v1151_v59 = vmul.f32 0.5, %v1150_v58 }
 0x8a3   :  { %v1152_v60 = vsub.f32 1.5, %v1151_v59 }
 0x8a5   :  { %v1153_v6 = vmul.f32 %v1412_v56, %v1152_v60 }
 0x8a7   :  { %v1157_v0 = vsel %vm1156_vm0, %v1412_v56, %v1153_v6 }
 0x8a8   :  { %v1158_v35 = vmul.f32 %v1157_v0, %v1142_v51 }
 0x8aa   :  { %v1159_v41 = vmul.f32 %v1158_v35, %v1130_v34 }
 0x8ac   :  { %v1160_v42 = vadd.f32 %v1159_v41, %v1131_v9 }
 0x8ae   :  { %v1162_v10 = vmul.f32 0.70710677, %v1160_v42  ;;  %v1161_v43 = vmul.f32 0.5, %v1160_v42 }
 0x8b0   :  { %v1163_v11 = vmul.f32 %v1162_v10, %v1162_v10 }
 0x8b2   :  { %v1164_v12 = vmin.f32 %v1163_v11, 16.0 }
 0x8b4   :  { %v1165_v13 = vmul.f32 2.1237322e-06, %v1164_v12  ;;  %v1176_v14 = vmul.f32 3.8918573e-05, %v1164_v12 }
 0x8b6   :  { %v1166_v15 = vadd.f32 0.00028619796, %v1165_v13  ;;  %v1177_v16 = vadd.f32 0.001143296, %v1176_v14 }
 0x8b8   :  { %v1167_v63 = vmul.f32 %v1166_v15, %v1164_v12  ;;  %v1178_v17 = vmul.f32 %v1177_v16, %v1164_v12 }
 0x8ba   :  { %v1179_v18 = vadd.f32 0.014752088, %v1178_v17  ;;  %v1168_v29 = vadd.f32 0.0036580483, %v1167_v63 }
 0x8bc   :  { %v1180_v3 = vmul.f32 %v1179_v18, %v1164_v12  ;;  %v1169_v20 = vmul.f32 %v1168_v29, %v1164_v12 }
 0x8be   :  { %v1181_v19 = vadd.f32 0.112945676, %v1180_v3  ;;  %v1170_v61 = vadd.f32 0.05243302, %v1169_v20 }
 0x8c0   :  { %v1182_v4 = vmul.f32 %v1181_v19, %v1164_v12  ;;  %v1171_v24 = vmul.f32 %v1170_v61, %v1164_v12 }
 0x8c2   :  { %v1183_v7 = vadd.f32 0.4994258, %v1182_v4  ;;  %v1172_v25 = vadd.f32 0.18741608, %v1171_v24 }
 0x8c4   :  { %v1184_v23 = vmul.f32 %v1183_v7, %v1164_v12  ;;  %v1173_v26 = vmul.f32 %v1172_v25, %v1164_v12 }
 0x8c6   :  { %v1185_v1 = vadd.f32 1.0, %v1184_v23  ;;  %v1174_v30 = vadd.f32 1.1283791, %v1173_v26 }
 0x8c8   :  { %1413 = vrcp.f32 %v1185_v1  ;;  %v1197_v28 = vand.u32 2147483648, %v1185_v1  ;;  %v1195_v32 = vand.u32 2147483647, %v1185_v1  ;;  %vm1191_vm2 = vweird.f32 %v1185_v1 }
 0x8c9   :  { %v1175_v36 = vmul.f32 %v1174_v30, %v1162_v10 }
 0x8ca   :  { %v1198_v62 = vor.u32 1.1754944e-38, %v1197_v28  ;;  %vm1196_vm4 = vcmp.eq.f32.partialorder %v1195_v32, 8.507059e+37 }
 0x8ce   :  { %v1414_v2 = vpop.eup %1413 }
 0x8cf   :  { %v1187_v27 = vmul.f32 %v1414_v2, %v1185_v1  ;;  %vm1192_vm1 = vweird.f32 %v1414_v2 }
 0x8d0   :  { %vm1193_vm3 = vmor %vm1191_vm2, %vm1192_vm1 }
 0x8d1   :  { %v1188_v5 = vsub.f32 1.0, %v1187_v27 }
 0x8d3   :  { %v1189_v31 = vmul.f32 %v1414_v2, %v1188_v5 }
 0x8d5   :  { %v1190_v33 = vadd.f32 %v1414_v2, %v1189_v31 }
 0x8d7   :  { %v1194_v37 = vsel %vm1193_vm3, %v1414_v2, %v1190_v33 }
 0x8d8   :  { %v1199_v8 = vsel %vm1196_vm4, %v1198_v62, %v1194_v37 }
 0x8d9   :  { %v1200_v39 = vmul.f32 %v1199_v8, %v1175_v36 }
 0x8db   :  { %v1372_v40 = vclamps-f32 %v1200_v39, 1.0 }
 0x8dd   :  { %v1203_v44 = vadd.f32 1.0, %v1372_v40 }
 0x8df   :  { %v1204_v45 = vmul.f32 %v1203_v44, %v1161_v43 }
 0x8e1   :  { %1205 = vst [vmem:[#allocation2] sm:$0xff] %v1204_v45 }
 0x8e2   :  { %1216 = dma.vmem_to_hbm [thread:$0]  %s1212_s11, 128, %s1214_s14, [#allocation3]  }
 0x8e3   :  { %1439 = dma.done.wait [#allocation3], 128  }
 0x8e4   :  { %1440 = vsyncadd [#allocation3], 4294967168 }
 0x8e5   :  { %1221 = vsyncpa [#allocation3], 1 }

</bundles_post_ra>
